<compile_context>
chip_gen: v6e
topology: v6e:2x2x1
jax: 0.10.0
libtpu: 0.0.40
codegen_flags: <defaults>
</compile_context>

<pallas_src>
import functools

import jax
import jax.numpy as jnp
from jax import lax
from jax.experimental import pallas as pl
from jax.experimental.pallas import tpu as pltpu


def lstm_mlp_kernel(x_ref,        # (T*Bp, I)  bf16, time-major, batch zero-padded
                    wih0_ref,     # (I, 4H)    bf16  layer-0 input weights (pre-T)
                    whh0_ref,     # (H, 4H)    bf16  layer-0 recurrent weights
                    b0_ref,       # (1, 4H)    f32   layer-0 bias (b_ih + b_hh)
                    wih_r_ref,    # (max(L-1,1), H, 4H) bf16  upper-layer input W
                    whh_r_ref,    # (max(L-1,1), H, 4H) bf16  upper-layer recur. W
                    br_ref,       # (max(L-1,1), 1, 4H) f32   upper-layer biases
                    w1_ref,       # (H, H2)    bf16
                    b1_ref,       # (1, H2)    f32
                    w2_ref,       # (H2, O)    bf16
                    b2_ref,       # (1, O)     f32
                    out_ref,      # (Bp, O)    f32
                    *, T, Bp, H, L):
    G = 4 * H
    cdt = jnp.bfloat16    # MXU operand dtype; accumulation & state stay f32

    # ---- Hoisted layer-0 input projection, bias folded in once (off-chain). --
    xg = (jnp.dot(x_ref[...], wih0_ref[...], preferred_element_type=jnp.float32)
          + jnp.broadcast_to(b0_ref[...], (T * Bp, G)))           # (T*Bp, 4H) f32

    # ---- Loop-invariant weights / biases hoisted once. ----------------------
    whh0 = whh0_ref[...]                                          # (H, 4H) bf16
    wihs = [wih_r_ref[l] for l in range(L - 1)]                   # (H, 4H) each
    whhs = [whh_r_ref[l] for l in range(L - 1)]
    brs = [jnp.broadcast_to(br_ref[l], (Bp, G)) for l in range(L - 1)]

    hs = [jnp.zeros((Bp, H), jnp.float32) for _ in range(L)]
    cs = [jnp.zeros((Bp, H), jnp.float32) for _ in range(L)]

    # ---- Wavefront recurrence, fully unrolled (T, L static & small). --------
    # PyTorch gate layout along 4H: [i, f, g, o].
    for s in range(T + L - 1):
        lo = max(0, s - (T - 1))
        hi = min(L, s + 1)                    # active layers: lo .. hi-1

        gate_parts = []
        for l in range(lo, hi):
            t = s - l
            if l == 0:
                # Input half + bias precomputed; only h @ W_hh left per step.
                g = (xg[t * Bp:(t + 1) * Bp, :]
                     + jnp.dot(hs[0].astype(cdt), whh0,
                               preferred_element_type=jnp.float32))
            else:
                # Two independent K=H dots (no lane-concat); bias folded onto
                # the recurrent partial sum.
                g = (jnp.dot(hs[l].astype(cdt), whhs[l - 1],
                             preferred_element_type=jnp.float32) + brs[l - 1]
                     + jnp.dot(hs[l - 1].astype(cdt), wihs[l - 1],
                               preferred_element_type=jnp.float32))
            gate_parts.append(g)

        n_act = hi - lo
        gates = gate_parts[0] if n_act == 1 else jnp.concatenate(gate_parts, 0)
        c_prev = cs[lo] if n_act == 1 else jnp.concatenate(cs[lo:hi], 0)

        # One stacked sigmoid + one stacked tanh (EUP) and one shared
        # elementwise block for every active cell of this wavefront step.
        sig = jax.nn.sigmoid(gates)
        tnh = jnp.tanh(gates)
        i_g = sig[:, 0 * H:1 * H]
        f_g = sig[:, 1 * H:2 * H]
        o_g = sig[:, 3 * H:4 * H]
        g_g = tnh[:, 2 * H:3 * H]
        c_new = f_g * c_prev + i_g * g_g
        h_new = o_g * jnp.tanh(c_new)

        for k, l in enumerate(range(lo, hi)):
            cs[l] = c_new[k * Bp:(k + 1) * Bp, :]
            hs[l] = h_new[k * Bp:(k + 1) * Bp, :]

    h_last = hs[L - 1]                        # == LSTM(x)[:, -1, :]

    # TODO(synk): nn.Dropout and the LSTM inter-layer dropout are identity in
    # eval mode; training-mode stochastic dropout (pltpu.prng_*) not applied.
    hid = jnp.maximum(
        jnp.dot(h_last.astype(cdt), w1_ref[...],
                preferred_element_type=jnp.float32) + b1_ref[...], 0.0)
    out_ref[...] = (jnp.dot(hid.astype(cdt), w2_ref[...],
                            preferred_element_type=jnp.float32) + b2_ref[...])


def prediction_model_forward(x, params):
    """x: (B, T, I) batch_first, like the PyTorch module (eval-mode forward)."""
    B, T, I = x.shape
    H = params["w_hh"][0].shape[1]
    L = len(params["w_ih"])
    O = params["w2"].shape[0]

    # Pad batch to a full sublane group (multiple of 8) so every per-step tile
    # is aligned and state/elementwise ops are unmasked full-vreg ops.
    Bp = max(8, ((B + 7) // 8) * 8)
    bf = jnp.bfloat16

    xt = jnp.transpose(x, (1, 0, 2)).astype(jnp.float32)           # (T, B, I)
    xt = jnp.pad(xt, ((0, 0), (0, Bp - B), (0, 0)))                # (T, Bp, I)
    x_flat = xt.reshape(T * Bp, I).astype(bf)                      # MXU operand

    wih0_t = params["w_ih"][0].T.astype(bf)                        # (I, 4H)
    whh0_t = params["w_hh"][0].T.astype(bf)                        # (H, 4H)
    b0 = params["b"][0][None, :].astype(jnp.float32)               # (1, 4H)
    if L > 1:
        wih_r = jnp.stack([params["w_ih"][l].T for l in range(1, L)]).astype(bf)
        whh_r = jnp.stack([params["w_hh"][l].T for l in range(1, L)]).astype(bf)
        b_r = jnp.stack([params["b"][l][None, :]
                         for l in range(1, L)]).astype(jnp.float32)
    else:
        wih_r = jnp.zeros((1, H, 4 * H), bf)                       # unused dummies
        whh_r = jnp.zeros((1, H, 4 * H), bf)
        b_r = jnp.zeros((1, 1, 4 * H), jnp.float32)
    w1_t = params["w1"].T.astype(bf)                               # (H, H//2)
    b1 = params["b1"][None, :].astype(jnp.float32)
    w2_t = params["w2"].T.astype(bf)                               # (H//2, O)
    b2 = params["b2"][None, :].astype(jnp.float32)

    kernel = functools.partial(lstm_mlp_kernel, T=T, Bp=Bp, H=H, L=L)
    vmem = pl.BlockSpec(memory_space=pltpu.MemorySpace.VMEM)

    out_p = pl.pallas_call(
        kernel,
        out_shape=jax.ShapeDtypeStruct((Bp, O), jnp.float32),
        in_specs=[vmem] * 11,
        out_specs=vmem,
    )(x_flat, wih0_t, whh0_t, b0, wih_r, whh_r, b_r, w1_t, b1, w2_t, b2)
    return out_p[:B]


def init_params(key, input_size, hidden_dim, num_layers, output_dim):
    """PyTorch-style shapes; deterministic uniform init."""
    H = hidden_dim
    keys = jax.random.split(key, 4 * num_layers + 4)
    kH = 1.0 / (H ** 0.5)
    w_ih, w_hh, b = [], [], []
    idx = 0
    for l in range(num_layers):
        in_f = input_size if l == 0 else H
        w_ih.append(jax.random.uniform(keys[idx], (4 * H, in_f), jnp.float32,
                                       -kH, kH)); idx += 1
        w_hh.append(jax.random.uniform(keys[idx], (4 * H, H), jnp.float32,
                                       -kH, kH)); idx += 1
        b_ih = jax.random.uniform(keys[idx], (4 * H,), jnp.float32, -kH, kH); idx += 1
        b_hh = jax.random.uniform(keys[idx], (4 * H,), jnp.float32, -kH, kH); idx += 1
        b.append(b_ih + b_hh)
    k1 = 1.0 / (H ** 0.5)
    w1 = jax.random.uniform(keys[idx], (H // 2, H), jnp.float32, -k1, k1); idx += 1
    b1 = jax.random.uniform(keys[idx], (H // 2,), jnp.float32, -k1, k1); idx += 1
    k2 = 1.0 / ((H // 2) ** 0.5)
    w2 = jax.random.uniform(keys[idx], (output_dim, H // 2), jnp.float32,
                            -k2, k2); idx += 1
    b2 = jax.random.uniform(keys[idx], (output_dim,), jnp.float32, -k2, k2)
    return dict(w_ih=w_ih, w_hh=w_hh, b=b, w1=w1, b1=b1, w2=w2, b2=b2)


def ref_forward(x, params):
    """Pure-JAX f32 reference (matches PyTorch LSTM eval-mode semantics)."""
    B, T, _ = x.shape
    H = params["w_hh"][0].shape[1]
    L = len(params["w_ih"])
    seq = x.astype(jnp.float32)
    for l in range(L):
        wih, whh, b = params["w_ih"][l], params["w_hh"][l], params["b"][l]

        def step(carry, x_t, wih=wih, whh=whh, b=b):
            h, c = carry
            gates = x_t @ wih.T + h @ whh.T + b
            i = jax.nn.sigmoid(gates[:, :H])
            f = jax.nn.sigmoid(gates[:, H:2 * H])
            g = jnp.tanh(gates[:, 2 * H:3 * H])
            o = jax.nn.sigmoid(gates[:, 3 * H:])
            c = f * c + i * g
            h = o * jnp.tanh(c)
            return (h, c), h

        h0 = jnp.zeros((B, H), jnp.float32)
        c0 = jnp.zeros((B, H), jnp.float32)
        _, hs = lax.scan(step, (h0, c0), jnp.transpose(seq, (1, 0, 2)))
        seq = jnp.transpose(hs, (1, 0, 2))
    last = seq[:, -1, :]
    hid = jnp.maximum(last @ params["w1"].T + params["b1"], 0.0)
    return hid @ params["w2"].T + params["b2"]


if __name__ == "__main__":
    # Small shapes: batch=2, seq=8, input_size=16, hidden_dim=32,
    # num_layers=2, output_dim=4.
    B, T, I, H, L, O = 2, 8, 16, 32, 2, 4

    key = jax.random.PRNGKey(0)
    kx, kp = jax.random.split(key)
    x = jax.random.normal(kx, (B, T, I), dtype=jnp.float32)
    params = init_params(kp, I, H, L, O)

    out = prediction_model_forward(x, params)
    out = jax.block_until_ready(out)
    assert out.shape == (B, O), out.shape

    ref = jax.block_until_ready(ref_forward(x, params))
    # Tolerance covers bf16 weight/operand quantization vs the f32 reference.
    assert jnp.allclose(out, ref, atol=2e-2, rtol=2e-2), (out, ref)

    print("KERNEL_OK")
</pallas_src>

<mosaic_0001>
module attributes {stable_mosaic.version = 11 : i64} {
  func.func @lstm_mlp_kernel(%arg0: memref<64x16xbf16, #tpu.memory_space<vmem>>, %arg1: memref<16x128xbf16, #tpu.memory_space<vmem>>, %arg2: memref<32x128xbf16, #tpu.memory_space<vmem>>, %arg3: memref<1x128xf32, #tpu.memory_space<vmem>>, %arg4: memref<1x32x128xbf16, #tpu.memory_space<vmem>>, %arg5: memref<1x32x128xbf16, #tpu.memory_space<vmem>>, %arg6: memref<1x1x128xf32, #tpu.memory_space<vmem>>, %arg7: memref<32x16xbf16, #tpu.memory_space<vmem>>, %arg8: memref<1x16xf32, #tpu.memory_space<vmem>>, %arg9: memref<16x4xbf16, #tpu.memory_space<vmem>>, %arg10: memref<1x4xf32, #tpu.memory_space<vmem>>, %arg11: memref<8x4xf32, #tpu.memory_space<vmem>>) attributes {dimension_semantics = [], scalar_prefetch = 0 : i64, scratch_operands = 0 : i64, tpu.core_type = #tpu.core_type<tc>} {
    %c0 = arith.constant 0 : index
    %c0_0 = arith.constant 0 : index
    %0 = vector.load %arg0[%c0, %c0_0] : memref<64x16xbf16, #tpu.memory_space<vmem>>, vector<64x16xbf16>
    %c0_1 = arith.constant 0 : index
    %c0_2 = arith.constant 0 : index
    %1 = vector.load %arg1[%c0_1, %c0_2] : memref<16x128xbf16, #tpu.memory_space<vmem>>, vector<16x128xbf16>
    %cst = arith.constant dense<0.000000e+00> : vector<64x128xf32>
    %2 = tpu.matmul %0, %1, %cst {dimension_numbers = #tpu.dot_dimension_numbers<[1], [0], [0], [1], [0, 0, 1, 1], [], []>} : vector<64x16xbf16>, vector<16x128xbf16>, vector<64x128xf32> -> vector<64x128xf32>
    %c0_3 = arith.constant 0 : index
    %c0_4 = arith.constant 0 : index
    %3 = vector.load %arg3[%c0_3, %c0_4] : memref<1x128xf32, #tpu.memory_space<vmem>>, vector<1x128xf32>
    %4 = vector.shape_cast %3 : vector<1x128xf32> to vector<1x128xf32>
    %5 = vector.broadcast %4 : vector<1x128xf32> to vector<64x128xf32>
    %6 = arith.addf %2, %5 : vector<64x128xf32>
    %c0_5 = arith.constant 0 : index
    %c0_6 = arith.constant 0 : index
    %7 = vector.load %arg2[%c0_5, %c0_6] : memref<32x128xbf16, #tpu.memory_space<vmem>>, vector<32x128xbf16>
    %c0_7 = arith.constant 0 : index
    %c0_8 = arith.constant 0 : index
    %c0_9 = arith.constant 0 : index
    %8 = vector.load %arg4[%c0_7, %c0_8, %c0_9] : memref<1x32x128xbf16, #tpu.memory_space<vmem>>, vector<1x32x128xbf16>
    %9 = vector.shape_cast %8 : vector<1x32x128xbf16> to vector<32x128xbf16>
    %c0_10 = arith.constant 0 : index
    %c0_11 = arith.constant 0 : index
    %c0_12 = arith.constant 0 : index
    %10 = vector.load %arg5[%c0_10, %c0_11, %c0_12] : memref<1x32x128xbf16, #tpu.memory_space<vmem>>, vector<1x32x128xbf16>
    %11 = vector.shape_cast %10 : vector<1x32x128xbf16> to vector<32x128xbf16>
    %c0_13 = arith.constant 0 : index
    %c0_14 = arith.constant 0 : index
    %c0_15 = arith.constant 0 : index
    %12 = vector.load %arg6[%c0_13, %c0_14, %c0_15] : memref<1x1x128xf32, #tpu.memory_space<vmem>>, vector<1x1x128xf32>
    %13 = vector.shape_cast %12 : vector<1x1x128xf32> to vector<1x128xf32>
    %14 = vector.shape_cast %13 : vector<1x128xf32> to vector<1x128xf32>
    %15 = vector.broadcast %14 : vector<1x128xf32> to vector<8x128xf32>
    %cst_16 = arith.constant 0.000000e+00 : f32
    %16 = vector.broadcast %cst_16 : f32 to vector<8x32xf32>
    %cst_17 = arith.constant 0.000000e+00 : f32
    %17 = vector.broadcast %cst_17 : f32 to vector<8x32xf32>
    %cst_18 = arith.constant 0.000000e+00 : f32
    %18 = vector.broadcast %cst_18 : f32 to vector<8x32xf32>
    %cst_19 = arith.constant 0.000000e+00 : f32
    %19 = vector.broadcast %cst_19 : f32 to vector<8x32xf32>
    %20 = vector.extract_strided_slice %6 {offsets = [0, 0], sizes = [8, 128], strides = [1, 1]} : vector<64x128xf32> to vector<8x128xf32>
    %21 = arith.truncf %16 : vector<8x32xf32> to vector<8x32xbf16>
    %cst_20 = arith.constant dense<0.000000e+00> : vector<8x128xf32>
    %22 = tpu.matmul %21, %7, %cst_20 {dimension_numbers = #tpu.dot_dimension_numbers<[1], [0], [0], [1], [0, 0, 1, 1], [], []>} : vector<8x32xbf16>, vector<32x128xbf16>, vector<8x128xf32> -> vector<8x128xf32>
    %23 = arith.addf %20, %22 : vector<8x128xf32>
    %24 = arith.negf %23 : vector<8x128xf32>
    %25 = math.exp %24 : vector<8x128xf32>
    %cst_21 = arith.constant 1.000000e+00 : f32
    %26 = vector.broadcast %cst_21 : f32 to vector<8x128xf32>
    %27 = arith.addf %26, %25 : vector<8x128xf32>
    %28 = arith.divf %26, %27 : vector<8x128xf32>
    %29 = math.tanh %23 : vector<8x128xf32>
    %30 = vector.extract_strided_slice %28 {offsets = [0, 0], sizes = [8, 32], strides = [1, 1]} : vector<8x128xf32> to vector<8x32xf32>
    %31 = vector.extract_strided_slice %28 {offsets = [0, 32], sizes = [8, 32], strides = [1, 1]} : vector<8x128xf32> to vector<8x32xf32>
    %32 = vector.extract_strided_slice %28 {offsets = [0, 96], sizes = [8, 32], strides = [1, 1]} : vector<8x128xf32> to vector<8x32xf32>
    %33 = vector.extract_strided_slice %29 {offsets = [0, 64], sizes = [8, 32], strides = [1, 1]} : vector<8x128xf32> to vector<8x32xf32>
    %34 = arith.mulf %31, %18 : vector<8x32xf32>
    %35 = arith.mulf %30, %33 : vector<8x32xf32>
    %36 = arith.addf %34, %35 : vector<8x32xf32>
    %37 = math.tanh %36 : vector<8x32xf32>
    %38 = arith.mulf %32, %37 : vector<8x32xf32>
    %39 = vector.extract_strided_slice %6 {offsets = [8, 0], sizes = [8, 128], strides = [1, 1]} : vector<64x128xf32> to vector<8x128xf32>
    %40 = arith.truncf %38 : vector<8x32xf32> to vector<8x32xbf16>
    %cst_22 = arith.constant dense<0.000000e+00> : vector<8x128xf32>
    %41 = tpu.matmul %40, %7, %cst_22 {dimension_numbers = #tpu.dot_dimension_numbers<[1], [0], [0], [1], [0, 0, 1, 1], [], []>} : vector<8x32xbf16>, vector<32x128xbf16>, vector<8x128xf32> -> vector<8x128xf32>
    %42 = arith.addf %39, %41 : vector<8x128xf32>
    %43 = arith.truncf %17 : vector<8x32xf32> to vector<8x32xbf16>
    %cst_23 = arith.constant dense<0.000000e+00> : vector<8x128xf32>
    %44 = tpu.matmul %43, %11, %cst_23 {dimension_numbers = #tpu.dot_dimension_numbers<[1], [0], [0], [1], [0, 0, 1, 1], [], []>} : vector<8x32xbf16>, vector<32x128xbf16>, vector<8x128xf32> -> vector<8x128xf32>
    %45 = arith.addf %44, %15 : vector<8x128xf32>
    %46 = arith.truncf %38 : vector<8x32xf32> to vector<8x32xbf16>
    %cst_24 = arith.constant dense<0.000000e+00> : vector<8x128xf32>
    %47 = tpu.matmul %46, %9, %cst_24 {dimension_numbers = #tpu.dot_dimension_numbers<[1], [0], [0], [1], [0, 0, 1, 1], [], []>} : vector<8x32xbf16>, vector<32x128xbf16>, vector<8x128xf32> -> vector<8x128xf32>
    %48 = arith.addf %45, %47 : vector<8x128xf32>
    %49 = tpu.concatenate %42, %48 in 0 : vector<8x128xf32>, vector<8x128xf32> -> vector<16x128xf32>
    %50 = tpu.concatenate %36, %19 in 0 : vector<8x32xf32>, vector<8x32xf32> -> vector<16x32xf32>
    %51 = arith.negf %49 : vector<16x128xf32>
    %52 = math.exp %51 : vector<16x128xf32>
    %cst_25 = arith.constant 1.000000e+00 : f32
    %53 = vector.broadcast %cst_25 : f32 to vector<16x128xf32>
    %54 = arith.addf %53, %52 : vector<16x128xf32>
    %55 = arith.divf %53, %54 : vector<16x128xf32>
    %56 = math.tanh %49 : vector<16x128xf32>
    %57 = vector.extract_strided_slice %55 {offsets = [0, 0], sizes = [16, 32], strides = [1, 1]} : vector<16x128xf32> to vector<16x32xf32>
    %58 = vector.extract_strided_slice %55 {offsets = [0, 32], sizes = [16, 32], strides = [1, 1]} : vector<16x128xf32> to vector<16x32xf32>
    %59 = vector.extract_strided_slice %55 {offsets = [0, 96], sizes = [16, 32], strides = [1, 1]} : vector<16x128xf32> to vector<16x32xf32>
    %60 = vector.extract_strided_slice %56 {offsets = [0, 64], sizes = [16, 32], strides = [1, 1]} : vector<16x128xf32> to vector<16x32xf32>
    %61 = arith.mulf %58, %50 : vector<16x32xf32>
    %62 = arith.mulf %57, %60 : vector<16x32xf32>
    %63 = arith.addf %61, %62 : vector<16x32xf32>
    %64 = math.tanh %63 : vector<16x32xf32>
    %65 = arith.mulf %59, %64 : vector<16x32xf32>
    %66 = vector.extract_strided_slice %63 {offsets = [0, 0], sizes = [8, 32], strides = [1, 1]} : vector<16x32xf32> to vector<8x32xf32>
    %67 = vector.extract_strided_slice %65 {offsets = [0, 0], sizes = [8, 32], strides = [1, 1]} : vector<16x32xf32> to vector<8x32xf32>
    %68 = vector.extract_strided_slice %63 {offsets = [8, 0], sizes = [8, 32], strides = [1, 1]} : vector<16x32xf32> to vector<8x32xf32>
    %69 = vector.extract_strided_slice %65 {offsets = [8, 0], sizes = [8, 32], strides = [1, 1]} : vector<16x32xf32> to vector<8x32xf32>
    %70 = vector.extract_strided_slice %6 {offsets = [16, 0], sizes = [8, 128], strides = [1, 1]} : vector<64x128xf32> to vector<8x128xf32>
    %71 = arith.truncf %67 : vector<8x32xf32> to vector<8x32xbf16>
    %cst_26 = arith.constant dense<0.000000e+00> : vector<8x128xf32>
    %72 = tpu.matmul %71, %7, %cst_26 {dimension_numbers = #tpu.dot_dimension_numbers<[1], [0], [0], [1], [0, 0, 1, 1], [], []>} : vector<8x32xbf16>, vector<32x128xbf16>, vector<8x128xf32> -> vector<8x128xf32>
    %73 = arith.addf %70, %72 : vector<8x128xf32>
    %74 = arith.truncf %69 : vector<8x32xf32> to vector<8x32xbf16>
    %cst_27 = arith.constant dense<0.000000e+00> : vector<8x128xf32>
    %75 = tpu.matmul %74, %11, %cst_27 {dimension_numbers = #tpu.dot_dimension_numbers<[1], [0], [0], [1], [0, 0, 1, 1], [], []>} : vector<8x32xbf16>, vector<32x128xbf16>, vector<8x128xf32> -> vector<8x128xf32>
    %76 = arith.addf %75, %15 : vector<8x128xf32>
    %77 = arith.truncf %67 : vector<8x32xf32> to vector<8x32xbf16>
    %cst_28 = arith.constant dense<0.000000e+00> : vector<8x128xf32>
    %78 = tpu.matmul %77, %9, %cst_28 {dimension_numbers = #tpu.dot_dimension_numbers<[1], [0], [0], [1], [0, 0, 1, 1], [], []>} : vector<8x32xbf16>, vector<32x128xbf16>, vector<8x128xf32> -> vector<8x128xf32>
    %79 = arith.addf %76, %78 : vector<8x128xf32>
    %80 = tpu.concatenate %73, %79 in 0 : vector<8x128xf32>, vector<8x128xf32> -> vector<16x128xf32>
    %81 = tpu.concatenate %66, %68 in 0 : vector<8x32xf32>, vector<8x32xf32> -> vector<16x32xf32>
    %82 = arith.negf %80 : vector<16x128xf32>
    %83 = math.exp %82 : vector<16x128xf32>
    %cst_29 = arith.constant 1.000000e+00 : f32
    %84 = vector.broadcast %cst_29 : f32 to vector<16x128xf32>
    %85 = arith.addf %84, %83 : vector<16x128xf32>
    %86 = arith.divf %84, %85 : vector<16x128xf32>
    %87 = math.tanh %80 : vector<16x128xf32>
    %88 = vector.extract_strided_slice %86 {offsets = [0, 0], sizes = [16, 32], strides = [1, 1]} : vector<16x128xf32> to vector<16x32xf32>
    %89 = vector.extract_strided_slice %86 {offsets = [0, 32], sizes = [16, 32], strides = [1, 1]} : vector<16x128xf32> to vector<16x32xf32>
    %90 = vector.extract_strided_slice %86 {offsets = [0, 96], sizes = [16, 32], strides = [1, 1]} : vector<16x128xf32> to vector<16x32xf32>
    %91 = vector.extract_strided_slice %87 {offsets = [0, 64], sizes = [16, 32], strides = [1, 1]} : vector<16x128xf32> to vector<16x32xf32>
    %92 = arith.mulf %89, %81 : vector<16x32xf32>
    %93 = arith.mulf %88, %91 : vector<16x32xf32>
    %94 = arith.addf %92, %93 : vector<16x32xf32>
    %95 = math.tanh %94 : vector<16x32xf32>
    %96 = arith.mulf %90, %95 : vector<16x32xf32>
    %97 = vector.extract_strided_slice %94 {offsets = [0, 0], sizes = [8, 32], strides = [1, 1]} : vector<16x32xf32> to vector<8x32xf32>
    %98 = vector.extract_strided_slice %96 {offsets = [0, 0], sizes = [8, 32], strides = [1, 1]} : vector<16x32xf32> to vector<8x32xf32>
    %99 = vector.extract_strided_slice %94 {offsets = [8, 0], sizes = [8, 32], strides = [1, 1]} : vector<16x32xf32> to vector<8x32xf32>
    %100 = vector.extract_strided_slice %96 {offsets = [8, 0], sizes = [8, 32], strides = [1, 1]} : vector<16x32xf32> to vector<8x32xf32>
    %101 = vector.extract_strided_slice %6 {offsets = [24, 0], sizes = [8, 128], strides = [1, 1]} : vector<64x128xf32> to vector<8x128xf32>
    %102 = arith.truncf %98 : vector<8x32xf32> to vector<8x32xbf16>
    %cst_30 = arith.constant dense<0.000000e+00> : vector<8x128xf32>
    %103 = tpu.matmul %102, %7, %cst_30 {dimension_numbers = #tpu.dot_dimension_numbers<[1], [0], [0], [1], [0, 0, 1, 1], [], []>} : vector<8x32xbf16>, vector<32x128xbf16>, vector<8x128xf32> -> vector<8x128xf32>
    %104 = arith.addf %101, %103 : vector<8x128xf32>
    %105 = arith.truncf %100 : vector<8x32xf32> to vector<8x32xbf16>
    %cst_31 = arith.constant dense<0.000000e+00> : vector<8x128xf32>
    %106 = tpu.matmul %105, %11, %cst_31 {dimension_numbers = #tpu.dot_dimension_numbers<[1], [0], [0], [1], [0, 0, 1, 1], [], []>} : vector<8x32xbf16>, vector<32x128xbf16>, vector<8x128xf32> -> vector<8x128xf32>
    %107 = arith.addf %106, %15 : vector<8x128xf32>
    %108 = arith.truncf %98 : vector<8x32xf32> to vector<8x32xbf16>
    %cst_32 = arith.constant dense<0.000000e+00> : vector<8x128xf32>
    %109 = tpu.matmul %108, %9, %cst_32 {dimension_numbers = #tpu.dot_dimension_numbers<[1], [0], [0], [1], [0, 0, 1, 1], [], []>} : vector<8x32xbf16>, vector<32x128xbf16>, vector<8x128xf32> -> vector<8x128xf32>
    %110 = arith.addf %107, %109 : vector<8x128xf32>
    %111 = tpu.concatenate %104, %110 in 0 : vector<8x128xf32>, vector<8x128xf32> -> vector<16x128xf32>
    %112 = tpu.concatenate %97, %99 in 0 : vector<8x32xf32>, vector<8x32xf32> -> vector<16x32xf32>
    %113 = arith.negf %111 : vector<16x128xf32>
    %114 = math.exp %113 : vector<16x128xf32>
    %cst_33 = arith.constant 1.000000e+00 : f32
    %115 = vector.broadcast %cst_33 : f32 to vector<16x128xf32>
    %116 = arith.addf %115, %114 : vector<16x128xf32>
    %117 = arith.divf %115, %116 : vector<16x128xf32>
    %118 = math.tanh %111 : vector<16x128xf32>
    %119 = vector.extract_strided_slice %117 {offsets = [0, 0], sizes = [16, 32], strides = [1, 1]} : vector<16x128xf32> to vector<16x32xf32>
    %120 = vector.extract_strided_slice %117 {offsets = [0, 32], sizes = [16, 32], strides = [1, 1]} : vector<16x128xf32> to vector<16x32xf32>
    %121 = vector.extract_strided_slice %117 {offsets = [0, 96], sizes = [16, 32], strides = [1, 1]} : vector<16x128xf32> to vector<16x32xf32>
    %122 = vector.extract_strided_slice %118 {offsets = [0, 64], sizes = [16, 32], strides = [1, 1]} : vector<16x128xf32> to vector<16x32xf32>
    %123 = arith.mulf %120, %112 : vector<16x32xf32>
    %124 = arith.mulf %119, %122 : vector<16x32xf32>
    %125 = arith.addf %123, %124 : vector<16x32xf32>
    %126 = math.tanh %125 : vector<16x32xf32>
    %127 = arith.mulf %121, %126 : vector<16x32xf32>
    %128 = vector.extract_strided_slice %125 {offsets = [0, 0], sizes = [8, 32], strides = [1, 1]} : vector<16x32xf32> to vector<8x32xf32>
    %129 = vector.extract_strided_slice %127 {offsets = [0, 0], sizes = [8, 32], strides = [1, 1]} : vector<16x32xf32> to vector<8x32xf32>
    %130 = vector.extract_strided_slice %125 {offsets = [8, 0], sizes = [8, 32], strides = [1, 1]} : vector<16x32xf32> to vector<8x32xf32>
    %131 = vector.extract_strided_slice %127 {offsets = [8, 0], sizes = [8, 32], strides = [1, 1]} : vector<16x32xf32> to vector<8x32xf32>
    %132 = vector.extract_strided_slice %6 {offsets = [32, 0], sizes = [8, 128], strides = [1, 1]} : vector<64x128xf32> to vector<8x128xf32>
    %133 = arith.truncf %129 : vector<8x32xf32> to vector<8x32xbf16>
    %cst_34 = arith.constant dense<0.000000e+00> : vector<8x128xf32>
    %134 = tpu.matmul %133, %7, %cst_34 {dimension_numbers = #tpu.dot_dimension_numbers<[1], [0], [0], [1], [0, 0, 1, 1], [], []>} : vector<8x32xbf16>, vector<32x128xbf16>, vector<8x128xf32> -> vector<8x128xf32>
    %135 = arith.addf %132, %134 : vector<8x128xf32>
    %136 = arith.truncf %131 : vector<8x32xf32> to vector<8x32xbf16>
    %cst_35 = arith.constant dense<0.000000e+00> : vector<8x128xf32>
    %137 = tpu.matmul %136, %11, %cst_35 {dimension_numbers = #tpu.dot_dimension_numbers<[1], [0], [0], [1], [0, 0, 1, 1], [], []>} : vector<8x32xbf16>, vector<32x128xbf16>, vector<8x128xf32> -> vector<8x128xf32>
    %138 = arith.addf %137, %15 : vector<8x128xf32>
    %139 = arith.truncf %129 : vector<8x32xf32> to vector<8x32xbf16>
    %cst_36 = arith.constant dense<0.000000e+00> : vector<8x128xf32>
    %140 = tpu.matmul %139, %9, %cst_36 {dimension_numbers = #tpu.dot_dimension_numbers<[1], [0], [0], [1], [0, 0, 1, 1], [], []>} : vector<8x32xbf16>, vector<32x128xbf16>, vector<8x128xf32> -> vector<8x128xf32>
    %141 = arith.addf %138, %140 : vector<8x128xf32>
    %142 = tpu.concatenate %135, %141 in 0 : vector<8x128xf32>, vector<8x128xf32> -> vector<16x128xf32>
    %143 = tpu.concatenate %128, %130 in 0 : vector<8x32xf32>, vector<8x32xf32> -> vector<16x32xf32>
    %144 = arith.negf %142 : vector<16x128xf32>
    %145 = math.exp %144 : vector<16x128xf32>
    %cst_37 = arith.constant 1.000000e+00 : f32
    %146 = vector.broadcast %cst_37 : f32 to vector<16x128xf32>
    %147 = arith.addf %146, %145 : vector<16x128xf32>
    %148 = arith.divf %146, %147 : vector<16x128xf32>
    %149 = math.tanh %142 : vector<16x128xf32>
    %150 = vector.extract_strided_slice %148 {offsets = [0, 0], sizes = [16, 32], strides = [1, 1]} : vector<16x128xf32> to vector<16x32xf32>
    %151 = vector.extract_strided_slice %148 {offsets = [0, 32], sizes = [16, 32], strides = [1, 1]} : vector<16x128xf32> to vector<16x32xf32>
    %152 = vector.extract_strided_slice %148 {offsets = [0, 96], sizes = [16, 32], strides = [1, 1]} : vector<16x128xf32> to vector<16x32xf32>
    %153 = vector.extract_strided_slice %149 {offsets = [0, 64], sizes = [16, 32], strides = [1, 1]} : vector<16x128xf32> to vector<16x32xf32>
    %154 = arith.mulf %151, %143 : vector<16x32xf32>
    %155 = arith.mulf %150, %153 : vector<16x32xf32>
    %156 = arith.addf %154, %155 : vector<16x32xf32>
    %157 = math.tanh %156 : vector<16x32xf32>
    %158 = arith.mulf %152, %157 : vector<16x32xf32>
    %159 = vector.extract_strided_slice %156 {offsets = [0, 0], sizes = [8, 32], strides = [1, 1]} : vector<16x32xf32> to vector<8x32xf32>
    %160 = vector.extract_strided_slice %158 {offsets = [0, 0], sizes = [8, 32], strides = [1, 1]} : vector<16x32xf32> to vector<8x32xf32>
    %161 = vector.extract_strided_slice %156 {offsets = [8, 0], sizes = [8, 32], strides = [1, 1]} : vector<16x32xf32> to vector<8x32xf32>
    %162 = vector.extract_strided_slice %158 {offsets = [8, 0], sizes = [8, 32], strides = [1, 1]} : vector<16x32xf32> to vector<8x32xf32>
    %163 = vector.extract_strided_slice %6 {offsets = [40, 0], sizes = [8, 128], strides = [1, 1]} : vector<64x128xf32> to vector<8x128xf32>
    %164 = arith.truncf %160 : vector<8x32xf32> to vector<8x32xbf16>
    %cst_38 = arith.constant dense<0.000000e+00> : vector<8x128xf32>
    %165 = tpu.matmul %164, %7, %cst_38 {dimension_numbers = #tpu.dot_dimension_numbers<[1], [0], [0], [1], [0, 0, 1, 1], [], []>} : vector<8x32xbf16>, vector<32x128xbf16>, vector<8x128xf32> -> vector<8x128xf32>
    %166 = arith.addf %163, %165 : vector<8x128xf32>
    %167 = arith.truncf %162 : vector<8x32xf32> to vector<8x32xbf16>
    %cst_39 = arith.constant dense<0.000000e+00> : vector<8x128xf32>
    %168 = tpu.matmul %167, %11, %cst_39 {dimension_numbers = #tpu.dot_dimension_numbers<[1], [0], [0], [1], [0, 0, 1, 1], [], []>} : vector<8x32xbf16>, vector<32x128xbf16>, vector<8x128xf32> -> vector<8x128xf32>
    %169 = arith.addf %168, %15 : vector<8x128xf32>
    %170 = arith.truncf %160 : vector<8x32xf32> to vector<8x32xbf16>
    %cst_40 = arith.constant dense<0.000000e+00> : vector<8x128xf32>
    %171 = tpu.matmul %170, %9, %cst_40 {dimension_numbers = #tpu.dot_dimension_numbers<[1], [0], [0], [1], [0, 0, 1, 1], [], []>} : vector<8x32xbf16>, vector<32x128xbf16>, vector<8x128xf32> -> vector<8x128xf32>
    %172 = arith.addf %169, %171 : vector<8x128xf32>
    %173 = tpu.concatenate %166, %172 in 0 : vector<8x128xf32>, vector<8x128xf32> -> vector<16x128xf32>
    %174 = tpu.concatenate %159, %161 in 0 : vector<8x32xf32>, vector<8x32xf32> -> vector<16x32xf32>
    %175 = arith.negf %173 : vector<16x128xf32>
    %176 = math.exp %175 : vector<16x128xf32>
    %cst_41 = arith.constant 1.000000e+00 : f32
    %177 = vector.broadcast %cst_41 : f32 to vector<16x128xf32>
    %178 = arith.addf %177, %176 : vector<16x128xf32>
    %179 = arith.divf %177, %178 : vector<16x128xf32>
    %180 = math.tanh %173 : vector<16x128xf32>
    %181 = vector.extract_strided_slice %179 {offsets = [0, 0], sizes = [16, 32], strides = [1, 1]} : vector<16x128xf32> to vector<16x32xf32>
    %182 = vector.extract_strided_slice %179 {offsets = [0, 32], sizes = [16, 32], strides = [1, 1]} : vector<16x128xf32> to vector<16x32xf32>
    %183 = vector.extract_strided_slice %179 {offsets = [0, 96], sizes = [16, 32], strides = [1, 1]} : vector<16x128xf32> to vector<16x32xf32>
    %184 = vector.extract_strided_slice %180 {offsets = [0, 64], sizes = [16, 32], strides = [1, 1]} : vector<16x128xf32> to vector<16x32xf32>
    %185 = arith.mulf %182, %174 : vector<16x32xf32>
    %186 = arith.mulf %181, %184 : vector<16x32xf32>
    %187 = arith.addf %185, %186 : vector<16x32xf32>
    %188 = math.tanh %187 : vector<16x32xf32>
    %189 = arith.mulf %183, %188 : vector<16x32xf32>
    %190 = vector.extract_strided_slice %187 {offsets = [0, 0], sizes = [8, 32], strides = [1, 1]} : vector<16x32xf32> to vector<8x32xf32>
    %191 = vector.extract_strided_slice %189 {offsets = [0, 0], sizes = [8, 32], strides = [1, 1]} : vector<16x32xf32> to vector<8x32xf32>
    %192 = vector.extract_strided_slice %187 {offsets = [8, 0], sizes = [8, 32], strides = [1, 1]} : vector<16x32xf32> to vector<8x32xf32>
    %193 = vector.extract_strided_slice %189 {offsets = [8, 0], sizes = [8, 32], strides = [1, 1]} : vector<16x32xf32> to vector<8x32xf32>
    %194 = vector.extract_strided_slice %6 {offsets = [48, 0], sizes = [8, 128], strides = [1, 1]} : vector<64x128xf32> to vector<8x128xf32>
    %195 = arith.truncf %191 : vector<8x32xf32> to vector<8x32xbf16>
    %cst_42 = arith.constant dense<0.000000e+00> : vector<8x128xf32>
    %196 = tpu.matmul %195, %7, %cst_42 {dimension_numbers = #tpu.dot_dimension_numbers<[1], [0], [0], [1], [0, 0, 1, 1], [], []>} : vector<8x32xbf16>, vector<32x128xbf16>, vector<8x128xf32> -> vector<8x128xf32>
    %197 = arith.addf %194, %196 : vector<8x128xf32>
    %198 = arith.truncf %193 : vector<8x32xf32> to vector<8x32xbf16>
    %cst_43 = arith.constant dense<0.000000e+00> : vector<8x128xf32>
    %199 = tpu.matmul %198, %11, %cst_43 {dimension_numbers = #tpu.dot_dimension_numbers<[1], [0], [0], [1], [0, 0, 1, 1], [], []>} : vector<8x32xbf16>, vector<32x128xbf16>, vector<8x128xf32> -> vector<8x128xf32>
    %200 = arith.addf %199, %15 : vector<8x128xf32>
    %201 = arith.truncf %191 : vector<8x32xf32> to vector<8x32xbf16>
    %cst_44 = arith.constant dense<0.000000e+00> : vector<8x128xf32>
    %202 = tpu.matmul %201, %9, %cst_44 {dimension_numbers = #tpu.dot_dimension_numbers<[1], [0], [0], [1], [0, 0, 1, 1], [], []>} : vector<8x32xbf16>, vector<32x128xbf16>, vector<8x128xf32> -> vector<8x128xf32>
    %203 = arith.addf %200, %202 : vector<8x128xf32>
    %204 = tpu.concatenate %197, %203 in 0 : vector<8x128xf32>, vector<8x128xf32> -> vector<16x128xf32>
    %205 = tpu.concatenate %190, %192 in 0 : vector<8x32xf32>, vector<8x32xf32> -> vector<16x32xf32>
    %206 = arith.negf %204 : vector<16x128xf32>
    %207 = math.exp %206 : vector<16x128xf32>
    %cst_45 = arith.constant 1.000000e+00 : f32
    %208 = vector.broadcast %cst_45 : f32 to vector<16x128xf32>
    %209 = arith.addf %208, %207 : vector<16x128xf32>
    %210 = arith.divf %208, %209 : vector<16x128xf32>
    %211 = math.tanh %204 : vector<16x128xf32>
    %212 = vector.extract_strided_slice %210 {offsets = [0, 0], sizes = [16, 32], strides = [1, 1]} : vector<16x128xf32> to vector<16x32xf32>
    %213 = vector.extract_strided_slice %210 {offsets = [0, 32], sizes = [16, 32], strides = [1, 1]} : vector<16x128xf32> to vector<16x32xf32>
    %214 = vector.extract_strided_slice %210 {offsets = [0, 96], sizes = [16, 32], strides = [1, 1]} : vector<16x128xf32> to vector<16x32xf32>
    %215 = vector.extract_strided_slice %211 {offsets = [0, 64], sizes = [16, 32], strides = [1, 1]} : vector<16x128xf32> to vector<16x32xf32>
    %216 = arith.mulf %213, %205 : vector<16x32xf32>
    %217 = arith.mulf %212, %215 : vector<16x32xf32>
    %218 = arith.addf %216, %217 : vector<16x32xf32>
    %219 = math.tanh %218 : vector<16x32xf32>
    %220 = arith.mulf %214, %219 : vector<16x32xf32>
    %221 = vector.extract_strided_slice %218 {offsets = [0, 0], sizes = [8, 32], strides = [1, 1]} : vector<16x32xf32> to vector<8x32xf32>
    %222 = vector.extract_strided_slice %220 {offsets = [0, 0], sizes = [8, 32], strides = [1, 1]} : vector<16x32xf32> to vector<8x32xf32>
    %223 = vector.extract_strided_slice %218 {offsets = [8, 0], sizes = [8, 32], strides = [1, 1]} : vector<16x32xf32> to vector<8x32xf32>
    %224 = vector.extract_strided_slice %220 {offsets = [8, 0], sizes = [8, 32], strides = [1, 1]} : vector<16x32xf32> to vector<8x32xf32>
    %225 = vector.extract_strided_slice %6 {offsets = [56, 0], sizes = [8, 128], strides = [1, 1]} : vector<64x128xf32> to vector<8x128xf32>
    %226 = arith.truncf %222 : vector<8x32xf32> to vector<8x32xbf16>
    %cst_46 = arith.constant dense<0.000000e+00> : vector<8x128xf32>
    %227 = tpu.matmul %226, %7, %cst_46 {dimension_numbers = #tpu.dot_dimension_numbers<[1], [0], [0], [1], [0, 0, 1, 1], [], []>} : vector<8x32xbf16>, vector<32x128xbf16>, vector<8x128xf32> -> vector<8x128xf32>
    %228 = arith.addf %225, %227 : vector<8x128xf32>
    %229 = arith.truncf %224 : vector<8x32xf32> to vector<8x32xbf16>
    %cst_47 = arith.constant dense<0.000000e+00> : vector<8x128xf32>
    %230 = tpu.matmul %229, %11, %cst_47 {dimension_numbers = #tpu.dot_dimension_numbers<[1], [0], [0], [1], [0, 0, 1, 1], [], []>} : vector<8x32xbf16>, vector<32x128xbf16>, vector<8x128xf32> -> vector<8x128xf32>
    %231 = arith.addf %230, %15 : vector<8x128xf32>
    %232 = arith.truncf %222 : vector<8x32xf32> to vector<8x32xbf16>
    %cst_48 = arith.constant dense<0.000000e+00> : vector<8x128xf32>
    %233 = tpu.matmul %232, %9, %cst_48 {dimension_numbers = #tpu.dot_dimension_numbers<[1], [0], [0], [1], [0, 0, 1, 1], [], []>} : vector<8x32xbf16>, vector<32x128xbf16>, vector<8x128xf32> -> vector<8x128xf32>
    %234 = arith.addf %231, %233 : vector<8x128xf32>
    %235 = tpu.concatenate %228, %234 in 0 : vector<8x128xf32>, vector<8x128xf32> -> vector<16x128xf32>
    %236 = tpu.concatenate %221, %223 in 0 : vector<8x32xf32>, vector<8x32xf32> -> vector<16x32xf32>
    %237 = arith.negf %235 : vector<16x128xf32>
    %238 = math.exp %237 : vector<16x128xf32>
    %cst_49 = arith.constant 1.000000e+00 : f32
    %239 = vector.broadcast %cst_49 : f32 to vector<16x128xf32>
    %240 = arith.addf %239, %238 : vector<16x128xf32>
    %241 = arith.divf %239, %240 : vector<16x128xf32>
    %242 = math.tanh %235 : vector<16x128xf32>
    %243 = vector.extract_strided_slice %241 {offsets = [0, 0], sizes = [16, 32], strides = [1, 1]} : vector<16x128xf32> to vector<16x32xf32>
    %244 = vector.extract_strided_slice %241 {offsets = [0, 32], sizes = [16, 32], strides = [1, 1]} : vector<16x128xf32> to vector<16x32xf32>
    %245 = vector.extract_strided_slice %241 {offsets = [0, 96], sizes = [16, 32], strides = [1, 1]} : vector<16x128xf32> to vector<16x32xf32>
    %246 = vector.extract_strided_slice %242 {offsets = [0, 64], sizes = [16, 32], strides = [1, 1]} : vector<16x128xf32> to vector<16x32xf32>
    %247 = arith.mulf %244, %236 : vector<16x32xf32>
    %248 = arith.mulf %243, %246 : vector<16x32xf32>
    %249 = arith.addf %247, %248 : vector<16x32xf32>
    %250 = math.tanh %249 : vector<16x32xf32>
    %251 = arith.mulf %245, %250 : vector<16x32xf32>
    %252 = vector.extract_strided_slice %251 {offsets = [0, 0], sizes = [8, 32], strides = [1, 1]} : vector<16x32xf32> to vector<8x32xf32>
    %253 = vector.extract_strided_slice %249 {offsets = [8, 0], sizes = [8, 32], strides = [1, 1]} : vector<16x32xf32> to vector<8x32xf32>
    %254 = vector.extract_strided_slice %251 {offsets = [8, 0], sizes = [8, 32], strides = [1, 1]} : vector<16x32xf32> to vector<8x32xf32>
    %255 = arith.truncf %254 : vector<8x32xf32> to vector<8x32xbf16>
    %cst_50 = arith.constant dense<0.000000e+00> : vector<8x128xf32>
    %256 = tpu.matmul %255, %11, %cst_50 {dimension_numbers = #tpu.dot_dimension_numbers<[1], [0], [0], [1], [0, 0, 1, 1], [], []>} : vector<8x32xbf16>, vector<32x128xbf16>, vector<8x128xf32> -> vector<8x128xf32>
    %257 = arith.addf %256, %15 : vector<8x128xf32>
    %258 = arith.truncf %252 : vector<8x32xf32> to vector<8x32xbf16>
    %cst_51 = arith.constant dense<0.000000e+00> : vector<8x128xf32>
    %259 = tpu.matmul %258, %9, %cst_51 {dimension_numbers = #tpu.dot_dimension_numbers<[1], [0], [0], [1], [0, 0, 1, 1], [], []>} : vector<8x32xbf16>, vector<32x128xbf16>, vector<8x128xf32> -> vector<8x128xf32>
    %260 = arith.addf %257, %259 : vector<8x128xf32>
    %261 = arith.negf %260 : vector<8x128xf32>
    %262 = math.exp %261 : vector<8x128xf32>
    %cst_52 = arith.constant 1.000000e+00 : f32
    %263 = vector.broadcast %cst_52 : f32 to vector<8x128xf32>
    %264 = arith.addf %263, %262 : vector<8x128xf32>
    %265 = arith.divf %263, %264 : vector<8x128xf32>
    %266 = math.tanh %260 : vector<8x128xf32>
    %267 = vector.extract_strided_slice %265 {offsets = [0, 0], sizes = [8, 32], strides = [1, 1]} : vector<8x128xf32> to vector<8x32xf32>
    %268 = vector.extract_strided_slice %265 {offsets = [0, 32], sizes = [8, 32], strides = [1, 1]} : vector<8x128xf32> to vector<8x32xf32>
    %269 = vector.extract_strided_slice %265 {offsets = [0, 96], sizes = [8, 32], strides = [1, 1]} : vector<8x128xf32> to vector<8x32xf32>
    %270 = vector.extract_strided_slice %266 {offsets = [0, 64], sizes = [8, 32], strides = [1, 1]} : vector<8x128xf32> to vector<8x32xf32>
    %271 = arith.mulf %268, %253 : vector<8x32xf32>
    %272 = arith.mulf %267, %270 : vector<8x32xf32>
    %273 = arith.addf %271, %272 : vector<8x32xf32>
    %274 = math.tanh %273 : vector<8x32xf32>
    %275 = arith.mulf %269, %274 : vector<8x32xf32>
    %276 = arith.truncf %275 : vector<8x32xf32> to vector<8x32xbf16>
    %c0_53 = arith.constant 0 : index
    %c0_54 = arith.constant 0 : index
    %277 = vector.load %arg7[%c0_53, %c0_54] : memref<32x16xbf16, #tpu.memory_space<vmem>>, vector<32x16xbf16>
    %cst_55 = arith.constant dense<0.000000e+00> : vector<8x16xf32>
    %278 = tpu.matmul %276, %277, %cst_55 {dimension_numbers = #tpu.dot_dimension_numbers<[1], [0], [0], [1], [0, 0, 1, 1], [], []>} : vector<8x32xbf16>, vector<32x16xbf16>, vector<8x16xf32> -> vector<8x16xf32>
    %c0_56 = arith.constant 0 : index
    %c0_57 = arith.constant 0 : index
    %279 = vector.load %arg8[%c0_56, %c0_57] : memref<1x16xf32, #tpu.memory_space<vmem>>, vector<1x16xf32>
    %280 = vector.broadcast %279 : vector<1x16xf32> to vector<8x16xf32>
    %281 = arith.addf %278, %280 : vector<8x16xf32>
    %cst_58 = arith.constant 0.000000e+00 : f32
    %282 = vector.broadcast %cst_58 : f32 to vector<8x16xf32>
    %283 = arith.maximumf %281, %282 : vector<8x16xf32>
    %284 = arith.truncf %283 : vector<8x16xf32> to vector<8x16xbf16>
    %c0_59 = arith.constant 0 : index
    %c0_60 = arith.constant 0 : index
    %285 = vector.load %arg9[%c0_59, %c0_60] : memref<16x4xbf16, #tpu.memory_space<vmem>>, vector<16x4xbf16>
    %cst_61 = arith.constant dense<0.000000e+00> : vector<8x4xf32>
    %286 = tpu.matmul %284, %285, %cst_61 {dimension_numbers = #tpu.dot_dimension_numbers<[1], [0], [0], [1], [0, 0, 1, 1], [], []>} : vector<8x16xbf16>, vector<16x4xbf16>, vector<8x4xf32> -> vector<8x4xf32>
    %c0_62 = arith.constant 0 : index
    %c0_63 = arith.constant 0 : index
    %287 = vector.load %arg10[%c0_62, %c0_63] : memref<1x4xf32, #tpu.memory_space<vmem>>, vector<1x4xf32>
    %288 = vector.broadcast %287 : vector<1x4xf32> to vector<8x4xf32>
    %289 = arith.addf %286, %288 : vector<8x4xf32>
    %c0_64 = arith.constant 0 : index
    %c0_65 = arith.constant 0 : index
    %290 = vector.load %arg11[%c0_64, %c0_65] : memref<8x4xf32, #tpu.memory_space<vmem>>, vector<8x4xf32>
    tpu.vector_store %arg11[%c0_64, %c0_65], %289 {strides = array<i32>} : memref<8x4xf32, #tpu.memory_space<vmem>>, vector<8x4xf32>,
    return
  }
}

</mosaic_0001>

<bundles_post_ra>
// kernel: tpu_custom_call.1
= control target key start
LH: loop header
LB: loop body
LE: loop exit
PB: predicated region body
PF: predicated region fallthrough
CT: control target
= control target key end

     0   :  { %v2331_v0 = vmov 0.0   ;;  %vm2332_vm0 = vmmov 0   ;;  %vm82_vm1 = vcmask 130048   ;;  %v2333_v6 = vmov 0   ;;  %s2334_s27 = smov 64   ;;  %s2335_s28 = smov 32   ;;  %s2806_s1 = inlined_call_operand.vmem [shape: bf16[16,128], index: 1, kind: input, shape index: {}]   ;;  %s2807_s2 = inlined_call_operand.vmem [shape: bf16[32,128], index: 2, kind: input, shape index: {}]   ;;  %s2808_s0 = inlined_call_operand.vmem [shape: bf16[64,16], index: 0, kind: input, shape index: {}]   ;;  %s2809_s3 = inlined_call_operand.vmem [shape: f32[1,128], index: 3, kind: input, shape index: {}]   ;;  %s2810_s5 = inlined_call_operand.vmem [shape: bf16[1,32,128], index: 5, kind: input, shape index: {}]   ;;  %s2811_s4 = inlined_call_operand.vmem [shape: bf16[1,32,128], index: 4, kind: input, shape index: {}]   ;;  %s2812_s6 = inlined_call_operand.vmem [shape: f32[1,1,128], index: 6, kind: input, shape index: {}]   ;;  %s2813_s7 = inlined_call_operand.vmem [shape: bf16[32,16], index: 7, kind: input, shape index: {}]   ;;  %s2814_s9 = inlined_call_operand.vmem [shape: bf16[16,4], index: 9, kind: input, shape index: {}]   ;;  %s2815_s8 = inlined_call_operand.vmem [shape: f32[1,16], index: 8, kind: input, shape index: {}]   ;;  %s2816_s10 = inlined_call_operand.vmem [shape: f32[1,4], index: 10, kind: input, shape index: {}]   ;;  %s2817_s11 = inlined_call_operand.vmem [shape: f32[8,4], index: 11, kind: output, shape index: {}]  }
   0x1   :  { %1974 = vmatprep.subr.bf16.mxu1 %v2331_v0  ;;  %v2185_v1 = vld [vmem:[%s2806_s1] sm:$0xff]   ;;  %1978 = vmatprep.mubr.msk.bf16.mxu1 %vm2332_vm0, %v2331_v0  ;;  %v2405_v2 = vld [vmem:[%s2807_s2 + $0x8] sm:$0xff]   ;;  %v2191_v26 = vld [vmem:[%s2808_s0 + $0x10] sm:$0xff]   ;;  %vm191_vm2 = vcmask 261120   ;;  %vm1814_vm3 = vcmask 31744  }
   0x2   :  { %1964 = vmatprep.subr.bf16.mxu0 %v2185_v1  ;;  %v2187_v3 = vld [vmem:[%s2808_s0] sm:$0xff]   ;;  %1975 = vmatpush3.bf16.msra.mxu1 %v2405_v2  ;;  %v2188_v4 = vld [vmem:[%s2808_s0 + $0x8] sm:$0xff]   ;;  %v2192_v27 = vld [vmem:[%s2808_s0 + $0x18] sm:$0xff]  }
   0x3   :  { %1965 = vmatpush3.bf16.msra.mxu0 %v2185_v1  ;;  %1966 = vmatprep.mubr.msk.bf16.mxu0 %vm82_vm1, %v2187_v3  ;;  %v2419_v5 = vld [vmem:[%s2807_s2] sm:$0xff]   ;;  %v2453_v28 = vld [vmem:[%s2810_s5 + $0x8] sm:$0xff]  }
   0x4   :  { %1976 = vmatprep.subr.bf16.mxu1 %v2331_v0  ;;  %1990 = vmatprep.subr.bf16.mxu0 %v2331_v0  ;;  %v2436_v8 = vld [vmem:[%s2809_s3] ss:$0 sm:$0xff]  ;;  %v2479_v34 = vld [vmem:[%s2811_s4 + $0x8] sm:$0xff]  }
   0x5   :  { %v2460_v29 = vld [vmem:[%s2810_s5] sm:$0xff]  }
   0x6   :  { %1967 = vmatmul.mubr.msk.bf16.vlgmr.msra.gmra.mxu0 %vm82_vm1, %v2188_v4  ;;  %1977 = vmatpush3.bf16.msra.mxu1 %v2419_v5  ;;  %v2486_v36 = vld [vmem:[%s2811_s4] sm:$0xff]  }
   0x7   :  { %1982 = vmatprep.subr.bf16.mxu1 %v2331_v0  ;;  %1970 = vmatprep.mubr.msk.bf16.mxu0 %vm82_vm1, %v2191_v26  ;;  %v2514_v50 = vld [vmem:[%s2812_s6] ss:$0 sm:$0xff] }
   0x8   :  { %1991 = vmatpush3.bf16.msra.mxu0 %v2453_v28 }
   0x9   :  { %1979 = vmatmul.mubr.bf16.vlgmr.msra.gmra.mxu1 %v2333_v6  ;;  %1992 = vmatprep.subr.bf16.mxu0 %v2331_v0 }
   0xa   :  { %1983 = vmatpush3.bf16.msra.mxu1 %v2405_v2  ;;  %1986 = vmatprep.mubr.msk.bf16.mxu1 %vm2332_vm0, %v2331_v0 }
   0xb   :  { %1984 = vmatprep.subr.bf16.mxu1 %v2331_v0 }
   0xc   :  { %1993 = vmatpush3.bf16.msra.mxu0 %v2460_v29 }
   0xd   :  { %2006 = vmatprep.subr.bf16.mxu0 %v2331_v0 }
   0xe   :  { %1985 = vmatpush3.bf16.msra.mxu1 %v2419_v5  ;;  %1971 = vmatmul.mubr.msk.bf16.gmra.mxu0 %vm82_vm1, %v2192_v27 }
   0xf   :  { %1998 = vmatprep.subr.bf16.mxu1 %v2331_v0  ;;  %1994 = vmatprep.mubr.msk.bf16.mxu0 %vm2332_vm0, %v2331_v0 }
  0x16   :  { %1995 = vmatmul.mubr.bf16.vlgmr.msra.gmra.mxu0 %v2333_v6 }
  0x17   :  { %2007 = vmatpush3.bf16.msra.mxu0 %v2405_v2  ;;  %2010 = vmatprep.mubr.msk.bf16.mxu0 %vm2332_vm0, %v2331_v0 }
  0x18   :  { %2008 = vmatprep.subr.bf16.mxu0 %v2331_v0 }
  0x1b   :  { %2009 = vmatpush3.bf16.msra.mxu0 %v2419_v5 }
  0x1c   :  { %2022 = vmatprep.subr.bf16.mxu0 %v2331_v0 }
  0xc6   :  { %v2431_v7 = vpop.f32.mrf.mxu0 }
  0xc8   :  { %v129_v9 = vpop.f32.mrf.mxu0 }
  0xc9   :  { %v130_v10 = vadd.f32 %v2436_v8, %v129_v9  ;;  %v229_v11 = vpop.f32.mrf.mxu1 }
  0xca   :  { %v2500_v37 = vpop.f32.mrf.mxu0 }
  0xcb   :  { %v235_v12 = vadd.f32 %v229_v11, %v130_v10  ;;  %v1980_v13 = vpop.f32.mrf.mxu1 }
  0xcc   :  { %v132_v38 = vpop.f32.mrf.mxu0 }
  0xcd   :  { %2199 = vtanh.f32 %v235_v12  ;;  %v232_v14 = vpop.f32.mrf.mxu1  ;;  %v1833_v17 = vmul.f32 -1.442695, %v235_v12  ;;  %v133_v47 = vadd.f32 %v2436_v8, %v132_v38 }
  0xce   :  { %v2502_v39 = vpop.f32.mrf.mxu0 }
  0xcf   :  { %v1981_v15 = vpop.f32.mrf.mxu1  ;;  %2201 = vpow2.f32 %v1833_v17 }
  0xd0   :  { %v2504_v40 = vpop.f32.mrf.mxu0 }
  0xd2   :  { %v2506_v41 = vpop.f32.mrf.mxu0 }
  0xd4   :  { %v2508_v42 = vpop.f32.mrf.mxu0 }
  0xd6   :  { %v354_v43 = vpop.f32.mrf.mxu0 }
  0xd7   :  { %v355_v53 = vadd.f32 %v2514_v50, %v354_v43 }
  0xd8   :  { %v1996_v44 = vpop.f32.mrf.mxu0 }
  0xda   :  { %v2200_v16 = vpop.eup %2199  ;;  %v357_v45 = vpop.f32.mrf.mxu0 }
  0xdb   :  { %245 = vrot.lane.b32.xlu0 %v2200_v16, %s2334_s27 }
  0xdc   :  { %v2202_v18 = vpop.eup %2201  ;;  %v1997_v46 = vpop.f32.mrf.mxu0 }
  0xdd   :  { %v239_v19 = vadd.f32 1.0, %v2202_v18 }
  0xdf   :  { %2203 = vrcp.f32 %v239_v19 }
  0xec   :  { %v2204_v20 = vpop.eup %2203 }
  0xed   :  { %v243_v23 = vmul.f32 0.0, %v2204_v20 }
 0x14d   :  { %v246_v21 = vpop.permute.xlu0 %245 }
 0x14e   :  { %v248_v22 = vmul.f32 %v2204_v20, %v246_v21 }
 0x150   :  { %250 = vrot.lane.b32.xlu0 %v248_v22, %s2335_s28 }
 0x1c2   :  { %v251_v24 = vpop.permute.xlu0 %250 }
 0x1c3   :  { %v2441_v25 = vadd.f32 %v251_v24, %v243_v23 }
 0x1c5   :  { %2205 = vtanh.f32 %v2441_v25 }
 0x1d2   :  { %v2206_v30 = vpop.eup %2205 }
 0x1d3   :  { %256 = vrot.lane.b32.xlu1 %v2206_v30, %s2334_s27 }
 0x245   :  { %v257_v31 = vpop.permute.xlu1 %256 }
 0x246   :  { %v259_v32 = vmul.f32 %v2204_v20, %v257_v31 }
 0x248   :  { %v260_v33 = vpack.c.bf16 %v259_v32, %v259_v32 }
 0x24a   :  { %262 = vrot.lane.b32.xlu1 %v260_v33, %s2335_s28  ;;  %v138_v33 = vadd.f32 %v2431_v7, %v2436_v8 }
 0x2bc   :  { %v263_v35 = vpop.permute.xlu1 %262 }
 0x2bd   :  { %1987 = vmatmul.mubr.msk.bf16.vlgmr.msra.gmra.mxu1 %vm191_vm2, %v263_v35 }
 0x2be   :  { %1999 = vmatpush3.bf16.msra.mxu1 %v2479_v34  ;;  %2002 = vmatprep.mubr.msk.bf16.mxu1 %vm2332_vm0, %v2331_v0 }
 0x2bf   :  { %2000 = vmatprep.subr.bf16.mxu1 %v2331_v0 }
 0x2c2   :  { %2001 = vmatpush3.bf16.msra.mxu1 %v2486_v36 }
 0x2c3   :  { %2014 = vmatprep.subr.bf16.mxu1 %v2331_v0 }
 0x2c5   :  { %2003 = vmatmul.mubr.msk.bf16.vlgmr.msra.gmra.mxu1 %vm191_vm2, %v263_v35 }
 0x2c6   :  { %2015 = vmatpush3.bf16.msra.mxu1 %v2453_v28  ;;  %2018 = vmatprep.mubr.msk.bf16.mxu1 %vm2332_vm0, %v2331_v0 }
 0x2c7   :  { %2016 = vmatprep.subr.bf16.mxu1 %v2331_v0 }
 0x2ca   :  { %2017 = vmatpush3.bf16.msra.mxu1 %v2460_v29 }
 0x2cb   :  { %2030 = vmatprep.subr.bf16.mxu1 %v2331_v0 }
 0x37d   :  { %v301_v48 = vpop.f32.mrf.mxu1 }
 0x37e   :  { %v307_v49 = vadd.f32 %v301_v48, %v133_v47 }
 0x37f   :  { %v1988_v51 = vpop.f32.mrf.mxu1 }
 0x380   :  { %2207 = vtanh.f32 %v307_v49  ;;  %v1840_v62 = vmul.f32 -1.442695, %v307_v49 }
 0x381   :  { %v304_v52 = vpop.f32.mrf.mxu1 }
 0x383   :  { %v1989_v54 = vpop.f32.mrf.mxu1 }
 0x385   :  { %v406_v55 = vpop.f32.mrf.mxu1 }
 0x386   :  { %v412_v56 = vadd.f32 %v406_v55, %v355_v53 }
 0x387   :  { %v2004_v57 = vpop.f32.mrf.mxu1 }
 0x388   :  { %2209 = vtanh.f32 %v412_v56  ;;  %v1841_v63 = vmul.f32 -1.442695, %v412_v56 }
 0x389   :  { %v409_v58 = vpop.f32.mrf.mxu1  ;;  %2211 = vpow2.f32 %v1840_v62 }
 0x38a   :  { %2213 = vpow2.f32 %v1841_v63 }
 0x38b   :  { %v2005_v59 = vpop.f32.mrf.mxu1 }
 0x38d   :  { %v2208_v60 = vpop.eup %2207 }
 0x38e   :  { %431 = vrot.lane.b32.xlu0 %v2208_v60, %s2334_s27 }
 0x395   :  { %v2210_v61 = vpop.eup %2209 }
 0x396   :  { %433 = vrot.lane.b32.xlu1 %v2210_v61, %s2334_s27  ;;  %v2212_v1 = vpop.eup %2211 }
 0x397   :  { %v419_v3 = vadd.f32 1.0, %v2212_v1  ;;  %v2214_v4 = vpop.eup %2213 }
 0x398   :  { %v420_v6 = vadd.f32 1.0, %v2214_v4 }
 0x399   :  { %2215 = vrcp.f32 %v419_v3 }
 0x39a   :  { %2217 = vrcp.f32 %v420_v6 }
 0x3a6   :  { %v2216_v9 = vpop.eup %2215 }
 0x3a7   :  { %v2218_v12 = vpop.eup %2217  ;;  %v427_v15 = vmul.f32 %v2216_v9, %v2441_v25 }
 0x3a8   :  { %v428_v18 = vmul.f32 0.0, %v2218_v12 }
 0x400   :  { %v432_v10 = vpop.permute.xlu0 %431 }
 0x401   :  { %v437_v11 = vmul.f32 %v2216_v9, %v432_v10 }
 0x403   :  { %441 = vrot.lane.b32.xlu0 %v437_v11, %s2335_s28 }
 0x408   :  { %v434_v13 = vpop.permute.xlu1 %433 }
 0x409   :  { %v438_v14 = vmul.f32 %v2218_v12, %v434_v13 }
 0x40b   :  { %443 = vrot.lane.b32.xlu1 %v438_v14, %s2335_s28 }
 0x475   :  { %v442_v16 = vpop.permute.xlu0 %441 }
 0x476   :  { %v2522_v17 = vadd.f32 %v442_v16, %v427_v15 }
 0x478   :  { %2219 = vtanh.f32 %v2522_v17 }
 0x47d   :  { %v444_v19 = vpop.permute.xlu1 %443 }
 0x47e   :  { %v2525_v20 = vadd.f32 %v444_v19, %v428_v18 }
 0x480   :  { %2221 = vtanh.f32 %v2525_v20 }
 0x485   :  { %v2220_v21 = vpop.eup %2219 }
 0x486   :  { %453 = vrot.lane.b32.xlu0 %v2220_v21, %s2334_s27 }
 0x48d   :  { %v2222_v22 = vpop.eup %2221 }
 0x48e   :  { %455 = vrot.lane.b32.xlu1 %v2222_v22, %s2334_s27 }
 0x4f8   :  { %v454_v23 = vpop.permute.xlu0 %453 }
 0x4f9   :  { %v459_v24 = vmul.f32 %v2216_v9, %v454_v23 }
 0x4fb   :  { %v461_v25 = vpack.c.bf16 %v459_v24, %v459_v24 }
 0x4fd   :  { %463 = vrot.lane.b32.xlu0 %v461_v25, %s2335_s28 }
 0x500   :  { %v456_v26 = vpop.permute.xlu1 %455 }
 0x501   :  { %v460_v27 = vmul.f32 %v2218_v12, %v456_v26 }
 0x503   :  { %v509_v30 = vpack.c.bf16 %v460_v27, %v460_v27  ;;  %v141_v27 = vadd.f32 %v2500_v37, %v2436_v8 }
 0x505   :  { %511 = vrot.lane.b32.xlu1 %v509_v30, %s2335_s28 }
 0x56f   :  { %v464_v31 = vpop.permute.xlu0 %463 }
 0x570   :  { %2011 = vmatmul.mubr.msk.bf16.vlgmr.msra.gmra.mxu0 %vm191_vm2, %v464_v31 }
 0x571   :  { %2023 = vmatpush3.bf16.msra.mxu0 %v2479_v34  ;;  %2026 = vmatprep.mubr.msk.bf16.mxu0 %vm2332_vm0, %v2331_v0 }
 0x572   :  { %2024 = vmatprep.subr.bf16.mxu0 %v2331_v0 }
 0x575   :  { %2025 = vmatpush3.bf16.msra.mxu0 %v2486_v36 }
 0x576   :  { %2038 = vmatprep.subr.bf16.mxu0 %v2331_v0 }
 0x577   :  { %v512_v32 = vpop.permute.xlu1 %511 }
 0x578   :  { %2019 = vmatmul.mubr.msk.bf16.vlgmr.msra.gmra.mxu1 %vm191_vm2, %v512_v32  ;;  %2027 = vmatmul.mubr.msk.bf16.vlgmr.msra.gmra.mxu0 %vm191_vm2, %v464_v31 }
 0x579   :  { %2031 = vmatpush3.bf16.msra.mxu1 %v2405_v2  ;;  %2034 = vmatprep.mubr.msk.bf16.mxu1 %vm2332_vm0, %v2331_v0 }
 0x57a   :  { %2032 = vmatprep.subr.bf16.mxu1 %v2331_v0  ;;  %2039 = vmatpush3.bf16.msra.mxu0 %v2453_v28 }
 0x57b   :  { %2040 = vmatprep.subr.bf16.mxu0 %v2331_v0  ;;  %2042 = vmatprep.mubr.msk.bf16.mxu0 %vm2332_vm0, %v2331_v0 }
 0x57d   :  { %2033 = vmatpush3.bf16.msra.mxu1 %v2419_v5 }
 0x57e   :  { %2046 = vmatprep.subr.bf16.mxu1 %v2331_v0  ;;  %2041 = vmatpush3.bf16.msra.mxu0 %v2460_v29 }
 0x57f   :  { %2054 = vmatprep.subr.bf16.mxu0 %v2331_v0 }
 0x630   :  { %v502_v35 = vpop.f32.mrf.mxu0 }
 0x631   :  { %v508_v38 = vadd.f32 %v502_v35, %v138_v33 }
 0x632   :  { %v2012_v43 = vpop.f32.mrf.mxu0 }
 0x633   :  { %2223 = vtanh.f32 %v508_v38  ;;  %v1845_v58 = vmul.f32 -1.442695, %v508_v38 }
 0x634   :  { %v505_v44 = vpop.f32.mrf.mxu0 }
 0x636   :  { %v2013_v45 = vpop.f32.mrf.mxu0 }
 0x638   :  { %v550_v46 = vpop.f32.mrf.mxu1  ;;  %v590_v47 = vpop.f32.mrf.mxu0 }
 0x639   :  { %v551_v48 = vadd.f32 %v2514_v50, %v550_v46 }
 0x63a   :  { %v2020_v49 = vpop.f32.mrf.mxu1  ;;  %v2028_v51 = vpop.f32.mrf.mxu0 }
 0x63b   :  { %v596_v52 = vadd.f32 %v590_v47, %v551_v48 }
 0x63c   :  { %v553_v53 = vpop.f32.mrf.mxu1  ;;  %v593_v54 = vpop.f32.mrf.mxu0 }
 0x63d   :  { %2225 = vtanh.f32 %v596_v52  ;;  %v1846_v59 = vmul.f32 -1.442695, %v596_v52 }
 0x63e   :  { %v2021_v55 = vpop.f32.mrf.mxu1  ;;  %v2029_v56 = vpop.f32.mrf.mxu0  ;;  %2227 = vpow2.f32 %v1845_v58 }
 0x63f   :  { %2229 = vpow2.f32 %v1846_v59 }
 0x640   :  { %v2224_v57 = vpop.eup %2223 }
 0x641   :  { %615 = vrot.lane.b32.xlu0 %v2224_v57, %s2334_s27 }
 0x64a   :  { %v2226_v7 = vpop.eup %2225 }
 0x64b   :  { %617 = vrot.lane.b32.xlu1 %v2226_v7, %s2334_s27  ;;  %v2228_v60 = vpop.eup %2227 }
 0x64c   :  { %v603_v61 = vadd.f32 1.0, %v2228_v60  ;;  %v2230_v62 = vpop.eup %2229 }
 0x64d   :  { %v604_v63 = vadd.f32 1.0, %v2230_v62 }
 0x64e   :  { %2231 = vrcp.f32 %v603_v61 }
 0x64f   :  { %2233 = vrcp.f32 %v604_v63 }
 0x65b   :  { %v2232_v1 = vpop.eup %2231 }
 0x65c   :  { %v2234_v6 = vpop.eup %2233  ;;  %v611_v11 = vmul.f32 %v2232_v1, %v2522_v17 }
 0x65d   :  { %v612_v14 = vmul.f32 %v2234_v6, %v2525_v20 }
 0x6b3   :  { %v616_v3 = vpop.permute.xlu0 %615 }
 0x6b4   :  { %v621_v4 = vmul.f32 %v2232_v1, %v616_v3 }
 0x6b6   :  { %625 = vrot.lane.b32.xlu0 %v621_v4, %s2335_s28 }
 0x6bd   :  { %v618_v9 = vpop.permute.xlu1 %617 }
 0x6be   :  { %v622_v10 = vmul.f32 %v2234_v6, %v618_v9 }
 0x6c0   :  { %627 = vrot.lane.b32.xlu1 %v622_v10, %s2335_s28 }
 0x728   :  { %v626_v12 = vpop.permute.xlu0 %625 }
 0x729   :  { %v2561_v13 = vadd.f32 %v626_v12, %v611_v11 }
 0x72b   :  { %2235 = vtanh.f32 %v2561_v13 }
 0x732   :  { %v628_v15 = vpop.permute.xlu1 %627 }
 0x733   :  { %v2565_v16 = vadd.f32 %v628_v15, %v612_v14 }
 0x735   :  { %2237 = vtanh.f32 %v2565_v16 }
 0x738   :  { %v2236_v18 = vpop.eup %2235 }
 0x739   :  { %637 = vrot.lane.b32.xlu0 %v2236_v18, %s2334_s27 }
 0x742   :  { %v2238_v19 = vpop.eup %2237 }
 0x743   :  { %639 = vrot.lane.b32.xlu1 %v2238_v19, %s2334_s27 }
 0x7ab   :  { %v638_v21 = vpop.permute.xlu0 %637 }
 0x7ac   :  { %v643_v17 = vmul.f32 %v2232_v1, %v638_v21 }
 0x7ae   :  { %v645_v22 = vpack.c.bf16 %v643_v17, %v643_v17 }
 0x7b0   :  { %647 = vrot.lane.b32.xlu0 %v645_v22, %s2335_s28 }
 0x7b5   :  { %v640_v23 = vpop.permute.xlu1 %639 }
 0x7b6   :  { %v644_v24 = vmul.f32 %v2234_v6, %v640_v23  ;;  %v146_v23 = vadd.f32 %v2436_v8, %v2504_v40 }
 0x7b8   :  { %v693_v25 = vpack.c.bf16 %v644_v24, %v644_v24 }
 0x7ba   :  { %695 = vrot.lane.b32.xlu1 %v693_v25, %s2335_s28 }
 0x822   :  { %v648_v20 = vpop.permute.xlu0 %647 }
 0x823   :  { %2035 = vmatmul.mubr.msk.bf16.vlgmr.msra.gmra.mxu1 %vm191_vm2, %v648_v20 }
 0x824   :  { %2047 = vmatpush3.bf16.msra.mxu1 %v2479_v34  ;;  %2050 = vmatprep.mubr.msk.bf16.mxu1 %vm2332_vm0, %v2331_v0 }
 0x825   :  { %2048 = vmatprep.subr.bf16.mxu1 %v2331_v0 }
 0x828   :  { %2049 = vmatpush3.bf16.msra.mxu1 %v2486_v36 }
 0x829   :  { %2062 = vmatprep.subr.bf16.mxu1 %v2331_v0 }
 0x82b   :  { %2051 = vmatmul.mubr.msk.bf16.vlgmr.msra.gmra.mxu1 %vm191_vm2, %v648_v20 }
 0x82c   :  { %v696_v26 = vpop.permute.xlu1 %695  ;;  %2063 = vmatpush3.bf16.msra.mxu1 %v2453_v28  ;;  %2066 = vmatprep.mubr.msk.bf16.mxu1 %vm2332_vm0, %v2331_v0 }
 0x82d   :  { %2043 = vmatmul.mubr.msk.bf16.vlgmr.msra.gmra.mxu0 %vm191_vm2, %v696_v26  ;;  %2064 = vmatprep.subr.bf16.mxu1 %v2331_v0 }
 0x82e   :  { %2055 = vmatpush3.bf16.msra.mxu0 %v2405_v2  ;;  %2058 = vmatprep.mubr.msk.bf16.mxu0 %vm2332_vm0, %v2331_v0 }
 0x82f   :  { %2056 = vmatprep.subr.bf16.mxu0 %v2331_v0 }
 0x830   :  { %2065 = vmatpush3.bf16.msra.mxu1 %v2460_v29 }
 0x831   :  { %2078 = vmatprep.subr.bf16.mxu1 %v2331_v0 }
 0x832   :  { %2057 = vmatpush3.bf16.msra.mxu0 %v2419_v5 }
 0x833   :  { %2070 = vmatprep.subr.bf16.mxu0 %v2331_v0 }
 0x8e3   :  { %v686_v30 = vpop.f32.mrf.mxu1 }
 0x8e4   :  { %v692_v31 = vadd.f32 %v686_v30, %v141_v27 }
 0x8e5   :  { %v2036_v32 = vpop.f32.mrf.mxu1 }
 0x8e6   :  { %2239 = vtanh.f32 %v692_v31  ;;  %v1850_v54 = vmul.f32 -1.442695, %v692_v31 }
 0x8e7   :  { %v689_v33 = vpop.f32.mrf.mxu1 }
 0x8e9   :  { %v2037_v35 = vpop.f32.mrf.mxu1 }
 0x8eb   :  { %v774_v38 = vpop.f32.mrf.mxu1 }
 0x8ed   :  { %v734_v43 = vpop.f32.mrf.mxu0  ;;  %v2052_v44 = vpop.f32.mrf.mxu1 }
 0x8ee   :  { %v735_v45 = vadd.f32 %v2514_v50, %v734_v43 }
 0x8ef   :  { %v2044_v46 = vpop.f32.mrf.mxu0  ;;  %v777_v47 = vpop.f32.mrf.mxu1 }
 0x8f0   :  { %v780_v48 = vadd.f32 %v774_v38, %v735_v45 }
 0x8f1   :  { %v737_v49 = vpop.f32.mrf.mxu0  ;;  %v2053_v51 = vpop.f32.mrf.mxu1 }
 0x8f2   :  { %2241 = vtanh.f32 %v780_v48  ;;  %v1851_v55 = vmul.f32 -1.442695, %v780_v48 }
 0x8f3   :  { %v2240_v52 = vpop.eup %2239  ;;  %v2045_v53 = vpop.f32.mrf.mxu0  ;;  %2243 = vpow2.f32 %v1850_v54 }
 0x8f4   :  { %799 = vrot.lane.b32.xlu0 %v2240_v52, %s2334_s27  ;;  %2245 = vpow2.f32 %v1851_v55 }
 0x8ff   :  { %v2242_v37 = vpop.eup %2241 }
 0x900   :  { %801 = vrot.lane.b32.xlu1 %v2242_v37, %s2334_s27  ;;  %v2244_v56 = vpop.eup %2243 }
 0x901   :  { %v787_v57 = vadd.f32 1.0, %v2244_v56  ;;  %v2246_v7 = vpop.eup %2245 }
 0x902   :  { %v788_v58 = vadd.f32 1.0, %v2246_v7 }
 0x903   :  { %2247 = vrcp.f32 %v787_v57 }
 0x904   :  { %2249 = vrcp.f32 %v788_v58 }
 0x910   :  { %v2248_v59 = vpop.eup %2247 }
 0x911   :  { %v2250_v62 = vpop.eup %2249  ;;  %v795_v3 = vmul.f32 %v2248_v59, %v2561_v13 }
 0x912   :  { %v796_v9 = vmul.f32 %v2250_v62, %v2565_v16 }
 0x966   :  { %v800_v60 = vpop.permute.xlu0 %799 }
 0x967   :  { %v805_v61 = vmul.f32 %v2248_v59, %v800_v60 }
 0x969   :  { %809 = vrot.lane.b32.xlu0 %v805_v61, %s2335_s28 }
 0x972   :  { %v802_v63 = vpop.permute.xlu1 %801 }
 0x973   :  { %v806_v1 = vmul.f32 %v2250_v62, %v802_v63 }
 0x975   :  { %811 = vrot.lane.b32.xlu1 %v806_v1, %s2335_s28 }
 0x9db   :  { %v810_v4 = vpop.permute.xlu0 %809 }
 0x9dc   :  { %v2601_v6 = vadd.f32 %v810_v4, %v795_v3 }
 0x9de   :  { %2251 = vtanh.f32 %v2601_v6 }
 0x9e7   :  { %v812_v10 = vpop.permute.xlu1 %811 }
 0x9e8   :  { %v2605_v11 = vadd.f32 %v812_v10, %v796_v9 }
 0x9ea   :  { %2253 = vtanh.f32 %v2605_v11 }
 0x9eb   :  { %v2252_v12 = vpop.eup %2251 }
 0x9ec   :  { %821 = vrot.lane.b32.xlu0 %v2252_v12, %s2334_s27 }
 0x9f7   :  { %v2254_v14 = vpop.eup %2253 }
 0x9f8   :  { %823 = vrot.lane.b32.xlu1 %v2254_v14, %s2334_s27 }
 0xa5e   :  { %v822_v15 = vpop.permute.xlu0 %821 }
 0xa5f   :  { %v827_v13 = vmul.f32 %v2248_v59, %v822_v15 }
 0xa61   :  { %v829_v18 = vpack.c.bf16 %v827_v13, %v827_v13 }
 0xa63   :  { %831 = vrot.lane.b32.xlu0 %v829_v18, %s2335_s28  ;;  %v149_v18 = vadd.f32 %v2436_v8, %v2508_v42 }
 0xa6a   :  { %v824_v19 = vpop.permute.xlu1 %823 }
 0xa6b   :  { %v828_v21 = vmul.f32 %v2250_v62, %v824_v19 }
 0xa6d   :  { %v877_v17 = vpack.c.bf16 %v828_v21, %v828_v21 }
 0xa6f   :  { %879 = vrot.lane.b32.xlu1 %v877_v17, %s2335_s28 }
 0xad5   :  { %v832_v16 = vpop.permute.xlu0 %831 }
 0xad6   :  { %2059 = vmatmul.mubr.msk.bf16.vlgmr.msra.gmra.mxu0 %vm191_vm2, %v832_v16 }
 0xad7   :  { %2071 = vmatpush3.bf16.msra.mxu0 %v2479_v34  ;;  %2074 = vmatprep.mubr.msk.bf16.mxu0 %vm2332_vm0, %v2331_v0 }
 0xad8   :  { %2072 = vmatprep.subr.bf16.mxu0 %v2331_v0 }
 0xadb   :  { %2073 = vmatpush3.bf16.msra.mxu0 %v2486_v36 }
 0xadc   :  { %2086 = vmatprep.subr.bf16.mxu0 %v2331_v0 }
 0xade   :  { %2075 = vmatmul.mubr.msk.bf16.vlgmr.msra.gmra.mxu0 %vm191_vm2, %v832_v16 }
 0xadf   :  { %2087 = vmatpush3.bf16.msra.mxu0 %v2453_v28  ;;  %2090 = vmatprep.mubr.msk.bf16.mxu0 %vm2332_vm0, %v2331_v0 }
 0xae0   :  { %2088 = vmatprep.subr.bf16.mxu0 %v2331_v0 }
 0xae1   :  { %v880_v22 = vpop.permute.xlu1 %879 }
 0xae2   :  { %2067 = vmatmul.mubr.msk.bf16.vlgmr.msra.gmra.mxu1 %vm191_vm2, %v880_v22 }
 0xae3   :  { %2079 = vmatpush3.bf16.msra.mxu1 %v2405_v2  ;;  %2082 = vmatprep.mubr.msk.bf16.mxu1 %vm2332_vm0, %v2331_v0 }
 0xae4   :  { %2080 = vmatprep.subr.bf16.mxu1 %v2331_v0  ;;  %2089 = vmatpush3.bf16.msra.mxu0 %v2460_v29 }
 0xae5   :  { %2102 = vmatprep.subr.bf16.mxu0 %v2331_v0 }
 0xae7   :  { %2081 = vmatpush3.bf16.msra.mxu1 %v2419_v5 }
 0xae8   :  { %2094 = vmatprep.subr.bf16.mxu1 %v2331_v0 }
 0xb96   :  { %v870_v24 = vpop.f32.mrf.mxu0 }
 0xb97   :  { %v876_v25 = vadd.f32 %v870_v24, %v146_v23 }
 0xb98   :  { %v2060_v20 = vpop.f32.mrf.mxu0 }
 0xb99   :  { %2255 = vtanh.f32 %v876_v25  ;;  %v1855_v48 = vmul.f32 -1.442695, %v876_v25 }
 0xb9a   :  { %v873_v26 = vpop.f32.mrf.mxu0 }
 0xb9c   :  { %v2061_v27 = vpop.f32.mrf.mxu0 }
 0xb9e   :  { %v958_v30 = vpop.f32.mrf.mxu0 }
 0xba0   :  { %v2076_v31 = vpop.f32.mrf.mxu0 }
 0xba2   :  { %v918_v32 = vpop.f32.mrf.mxu1  ;;  %v961_v33 = vpop.f32.mrf.mxu0 }
 0xba3   :  { %v919_v35 = vadd.f32 %v2514_v50, %v918_v32 }
 0xba4   :  { %v2068_v38 = vpop.f32.mrf.mxu1  ;;  %v2077_v43 = vpop.f32.mrf.mxu0 }
 0xba5   :  { %v964_v44 = vadd.f32 %v958_v30, %v919_v35 }
 0xba6   :  { %v2256_v45 = vpop.eup %2255  ;;  %v921_v46 = vpop.f32.mrf.mxu1 }
 0xba7   :  { %2257 = vtanh.f32 %v964_v44  ;;  %983 = vrot.lane.b32.xlu0 %v2256_v45, %s2334_s27  ;;  %v1856_v49 = vmul.f32 -1.442695, %v964_v44 }
 0xba8   :  { %v2069_v40 = vpop.f32.mrf.mxu1  ;;  %2259 = vpow2.f32 %v1855_v48 }
 0xba9   :  { %2261 = vpow2.f32 %v1856_v49 }
 0xbb4   :  { %v2258_v47 = vpop.eup %2257 }
 0xbb5   :  { %985 = vrot.lane.b32.xlu1 %v2258_v47, %s2334_s27  ;;  %v2260_v51 = vpop.eup %2259 }
 0xbb6   :  { %v971_v52 = vadd.f32 1.0, %v2260_v51  ;;  %v2262_v53 = vpop.eup %2261 }
 0xbb7   :  { %v972_v37 = vadd.f32 1.0, %v2262_v53 }
 0xbb8   :  { %2263 = vrcp.f32 %v971_v52 }
 0xbb9   :  { %2265 = vrcp.f32 %v972_v37 }
 0xbc5   :  { %v2264_v54 = vpop.eup %2263 }
 0xbc6   :  { %v2266_v57 = vpop.eup %2265  ;;  %v979_v59 = vmul.f32 %v2264_v54, %v2601_v6 }
 0xbc7   :  { %v980_v62 = vmul.f32 %v2266_v57, %v2605_v11 }
 0xc19   :  { %v984_v55 = vpop.permute.xlu0 %983 }
 0xc1a   :  { %v989_v56 = vmul.f32 %v2264_v54, %v984_v55 }
 0xc1c   :  { %993 = vrot.lane.b32.xlu0 %v989_v56, %s2335_s28 }
 0xc27   :  { %v986_v7 = vpop.permute.xlu1 %985 }
 0xc28   :  { %v990_v58 = vmul.f32 %v2266_v57, %v986_v7 }
 0xc2a   :  { %995 = vrot.lane.b32.xlu1 %v990_v58, %s2335_s28 }
 0xc8e   :  { %v994_v60 = vpop.permute.xlu0 %993 }
 0xc8f   :  { %v2641_v61 = vadd.f32 %v994_v60, %v979_v59 }
 0xc91   :  { %2267 = vtanh.f32 %v2641_v61 }
 0xc9c   :  { %v996_v63 = vpop.permute.xlu1 %995 }
 0xc9d   :  { %v2645_v1 = vadd.f32 %v996_v63, %v980_v62 }
 0xc9e   :  { %v2268_v3 = vpop.eup %2267 }
 0xc9f   :  { %2269 = vtanh.f32 %v2645_v1  ;;  %1005 = vrot.lane.b32.xlu0 %v2268_v3, %s2334_s27 }
 0xcac   :  { %v2270_v4 = vpop.eup %2269 }
 0xcad   :  { %1007 = vrot.lane.b32.xlu1 %v2270_v4, %s2334_s27 }
 0xd11   :  { %v1006_v9 = vpop.permute.xlu0 %1005 }
 0xd12   :  { %v1011_v6 = vmul.f32 %v2264_v54, %v1006_v9 }
 0xd14   :  { %v1013_v10 = vpack.c.bf16 %v1011_v6, %v1011_v6 }
 0xd16   :  { %1015 = vrot.lane.b32.xlu0 %v1013_v10, %s2335_s28 }
 0xd1f   :  { %v1008_v12 = vpop.permute.xlu1 %1007 }
 0xd20   :  { %v1012_v14 = vmul.f32 %v2266_v57, %v1008_v12 }
 0xd22   :  { %v1061_v15 = vpack.c.bf16 %v1012_v14, %v1012_v14 }
 0xd24   :  { %1063 = vrot.lane.b32.xlu1 %v1061_v15, %s2335_s28 }
 0xd88   :  { %v1016_v11 = vpop.permute.xlu0 %1015 }
 0xd89   :  { %2083 = vmatmul.mubr.msk.bf16.vlgmr.msra.gmra.mxu1 %vm191_vm2, %v1016_v11 }
 0xd8a   :  { %2095 = vmatpush3.bf16.msra.mxu1 %v2479_v34  ;;  %2098 = vmatprep.mubr.msk.bf16.mxu1 %vm2332_vm0, %v2331_v0 }
 0xd8b   :  { %2096 = vmatprep.subr.bf16.mxu1 %v2331_v0 }
 0xd8e   :  { %2097 = vmatpush3.bf16.msra.mxu1 %v2486_v36 }
 0xd8f   :  { %2110 = vmatprep.subr.bf16.mxu1 %v2331_v0 }
 0xd91   :  { %2099 = vmatmul.mubr.msk.bf16.vlgmr.msra.gmra.mxu1 %vm191_vm2, %v1016_v11 }
 0xd92   :  { %2111 = vmatpush3.bf16.msra.mxu1 %v2453_v28  ;;  %2114 = vmatprep.mubr.msk.bf16.mxu1 %vm2332_vm0, %v2331_v0 }
 0xd93   :  { %2112 = vmatprep.subr.bf16.mxu1 %v2331_v0 }
 0xd96   :  { %v1064_v13 = vpop.permute.xlu1 %1063  ;;  %2113 = vmatpush3.bf16.msra.mxu1 %v2460_v29 }
 0xd97   :  { %2091 = vmatmul.mubr.msk.bf16.vlgmr.msra.gmra.mxu0 %vm191_vm2, %v1064_v13  ;;  %2126 = vmatprep.subr.bf16.mxu1 %v2331_v0 }
 0xd98   :  { %2103 = vmatpush3.bf16.msra.mxu0 %v2405_v2  ;;  %2106 = vmatprep.mubr.msk.bf16.mxu0 %vm2332_vm0, %v2331_v0 }
 0xd99   :  { %2104 = vmatprep.subr.bf16.mxu0 %v2331_v0 }
 0xd9c   :  { %2105 = vmatpush3.bf16.msra.mxu0 %v2419_v5 }
 0xd9d   :  { %2118 = vmatprep.subr.bf16.mxu0 %v2331_v0 }
 0xe49   :  { %v1054_v19 = vpop.f32.mrf.mxu1 }
 0xe4a   :  { %v1060_v21 = vadd.f32 %v1054_v19, %v149_v18 }
 0xe4b   :  { %v2084_v17 = vpop.f32.mrf.mxu1 }
 0xe4c   :  { %2271 = vtanh.f32 %v1060_v21  ;;  %v1860_v38 = vmul.f32 -1.442695, %v1060_v21 }
 0xe4d   :  { %v1057_v16 = vpop.f32.mrf.mxu1 }
 0xe4f   :  { %v2085_v22 = vpop.f32.mrf.mxu1 }
 0xe51   :  { %v1142_v23 = vpop.f32.mrf.mxu1 }
 0xe53   :  { %v2100_v24 = vpop.f32.mrf.mxu1 }
 0xe55   :  { %v1145_v25 = vpop.f32.mrf.mxu1 }
 0xe57   :  { %v1102_v20 = vpop.f32.mrf.mxu0  ;;  %v2101_v26 = vpop.f32.mrf.mxu1 }
 0xe58   :  { %v1103_v27 = vadd.f32 %v2514_v50, %v1102_v20 }
 0xe59   :  { %v2272_v30 = vpop.eup %2271  ;;  %v2092_v31 = vpop.f32.mrf.mxu0 }
 0xe5a   :  { %v1148_v32 = vadd.f32 %v1142_v23, %v1103_v27  ;;  %1167 = vrot.lane.b32.xlu0 %v2272_v30, %s2334_s27 }
 0xe5b   :  { %v1105_v33 = vpop.f32.mrf.mxu0 }
 0xe5c   :  { %2273 = vtanh.f32 %v1148_v32  ;;  %v1861_v43 = vmul.f32 -1.442695, %v1148_v32 }
 0xe5d   :  { %v2093_v42 = vpop.f32.mrf.mxu0  ;;  %2275 = vpow2.f32 %v1860_v38 }
 0xe5e   :  { %2277 = vpow2.f32 %v1861_v43 }
 0xe69   :  { %v2274_v35 = vpop.eup %2273 }
 0xe6a   :  { %1169 = vrot.lane.b32.xlu1 %v2274_v35, %s2334_s27  ;;  %v2276_v44 = vpop.eup %2275 }
 0xe6b   :  { %v1155_v45 = vadd.f32 1.0, %v2276_v44  ;;  %v2278_v46 = vpop.eup %2277 }
 0xe6c   :  { %v1156_v40 = vadd.f32 1.0, %v2278_v46 }
 0xe6d   :  { %2279 = vrcp.f32 %v1155_v45 }
 0xe6e   :  { %2281 = vrcp.f32 %v1156_v40 }
 0xe7a   :  { %v2280_v47 = vpop.eup %2279 }
 0xe7b   :  { %v2282_v51 = vpop.eup %2281  ;;  %v1163_v37 = vmul.f32 %v2280_v47, %v2641_v61 }
 0xe7c   :  { %v1164_v56 = vmul.f32 %v2282_v51, %v2645_v1 }
 0xecc   :  { %v1168_v48 = vpop.permute.xlu0 %1167 }
 0xecd   :  { %v1173_v49 = vmul.f32 %v2280_v47, %v1168_v48 }
 0xecf   :  { %1177 = vrot.lane.b32.xlu0 %v1173_v49, %s2335_s28 }
 0xedc   :  { %v1170_v52 = vpop.permute.xlu1 %1169 }
 0xedd   :  { %v1174_v53 = vmul.f32 %v2282_v51, %v1170_v52 }
 0xedf   :  { %1179 = vrot.lane.b32.xlu1 %v1174_v53, %s2335_s28 }
 0xf41   :  { %v1178_v54 = vpop.permute.xlu0 %1177 }
 0xf42   :  { %v2681_v55 = vadd.f32 %v1178_v54, %v1163_v37 }
 0xf44   :  { %2283 = vtanh.f32 %v2681_v55 }
 0xf51   :  { %v2284_v57 = vpop.eup %2283  ;;  %v1180_v7 = vpop.permute.xlu1 %1179 }
 0xf52   :  { %v2685_v58 = vadd.f32 %v1180_v7, %v1164_v56  ;;  %1189 = vrot.lane.b32.xlu0 %v2284_v57, %s2334_s27  ;;  %v2327_v56 = vld [vmem:[%s2810_s5 + $0x8] sm:$0xff]  }
 0xf54   :  { %2285 = vtanh.f32 %v2685_v58 }
 0xf61   :  { %v2286_v59 = vpop.eup %2285 }
 0xf62   :  { %1191 = vrot.lane.b32.xlu1 %v2286_v59, %s2334_s27 }
 0xfc4   :  { %v1190_v60 = vpop.permute.xlu0 %1189 }
 0xfc5   :  { %v1195_v61 = vmul.f32 %v2280_v47, %v1190_v60 }
 0xfc7   :  { %v1197_v62 = vpack.c.bf16 %v1195_v61, %v1195_v61 }
 0xfc9   :  { %1199 = vrot.lane.b32.xlu0 %v1197_v62, %s2335_s28 }
 0xfd4   :  { %v1192_v63 = vpop.permute.xlu1 %1191 }
 0xfd5   :  { %v1196_v3 = vmul.f32 %v2282_v51, %v1192_v63 }
 0xfd7   :  { %v1245_v4 = vpack.c.bf16 %v1196_v3, %v1196_v3 }
 0xfd9   :  { %1247 = vrot.lane.b32.xlu1 %v1245_v4, %s2335_s28 }
0x103b   :  { %v1200_v1 = vpop.permute.xlu0 %1199 }
0x103c   :  { %2107 = vmatmul.mubr.msk.bf16.vlgmr.msra.gmra.mxu0 %vm191_vm2, %v1200_v1 }
0x103d   :  { %2119 = vmatpush3.bf16.msra.mxu0 %v2479_v34  ;;  %2122 = vmatprep.mubr.msk.bf16.mxu0 %vm2332_vm0, %v2331_v0 }
0x103e   :  { %2120 = vmatprep.subr.bf16.mxu0 %v2331_v0 }
0x1041   :  { %2121 = vmatpush3.bf16.msra.mxu0 %v2486_v36 }
0x1042   :  { %2134 = vmatprep.subr.bf16.mxu0 %v2331_v0 }
0x1044   :  { %2123 = vmatmul.mubr.msk.bf16.vlgmr.msra.gmra.mxu0 %vm191_vm2, %v1200_v1 }
0x1045   :  { %2135 = vmatpush3.bf16.msra.mxu0 %v2453_v28  ;;  %2138 = vmatprep.mubr.msk.bf16.mxu0 %vm2332_vm0, %v2331_v0  ;;  %v154_v28 = vadd.f32 %v2502_v39, %v2436_v8 }
0x1046   :  { %2136 = vmatprep.subr.bf16.mxu0 %v2331_v0 }
0x1049   :  { %2137 = vmatpush3.bf16.msra.mxu0 %v2460_v29 }
0x104a   :  { %2150 = vmatprep.subr.bf16.mxu0 %v2331_v0 }
0x104b   :  { %v1248_v9 = vpop.permute.xlu1 %1247 }
0x104c   :  { %2115 = vmatmul.mubr.msk.bf16.vlgmr.msra.gmra.mxu1 %vm191_vm2, %v1248_v9 }
0x104d   :  { %2127 = vmatpush3.bf16.msra.mxu1 %v2405_v2  ;;  %2130 = vmatprep.mubr.msk.bf16.mxu1 %vm2332_vm0, %v2331_v0 }
0x104e   :  { %2128 = vmatprep.subr.bf16.mxu1 %v2331_v0 }
0x1051   :  { %2129 = vmatpush3.bf16.msra.mxu1 %v2419_v5 }
0x1052   :  { %2142 = vmatprep.subr.bf16.mxu1 %v2331_v0 }
0x10fc   :  { %v1238_v29 = vpop.f32.mrf.mxu0 }
0x10fd   :  { %v1244_v6 = vadd.f32 %v1238_v29, %v154_v28 }
0x10fe   :  { %v2108_v10 = vpop.f32.mrf.mxu0 }
0x10ff   :  { %2287 = vtanh.f32 %v1244_v6  ;;  %v1865_v22 = vmul.f32 -1.442695, %v1244_v6 }
0x1100   :  { %v1241_v12 = vpop.f32.mrf.mxu0 }
0x1102   :  { %v2109_v14 = vpop.f32.mrf.mxu0 }
0x1104   :  { %v1326_v15 = vpop.f32.mrf.mxu0 }
0x1106   :  { %v2124_v2 = vpop.f32.mrf.mxu0 }
0x1108   :  { %v1329_v11 = vpop.f32.mrf.mxu0 }
0x110a   :  { %v2125_v13 = vpop.f32.mrf.mxu0 }
0x110c   :  { %v2288_v18 = vpop.eup %2287  ;;  %v1286_v19 = vpop.f32.mrf.mxu1 }
0x110d   :  { %v1287_v21 = vadd.f32 %v2514_v50, %v1286_v19  ;;  %1351 = vrot.lane.b32.xlu0 %v2288_v18, %s2334_s27 }
0x110e   :  { %v2116_v5 = vpop.f32.mrf.mxu1 }
0x110f   :  { %v1332_v17 = vadd.f32 %v1326_v15, %v1287_v21 }
0x1110   :  { %v1289_v16 = vpop.f32.mrf.mxu1 }
0x1111   :  { %2289 = vtanh.f32 %v1332_v17  ;;  %v1866_v24 = vmul.f32 -1.442695, %v1332_v17 }
0x1112   :  { %v2117_v8 = vpop.f32.mrf.mxu1  ;;  %2291 = vpow2.f32 %v1865_v22 }
0x1113   :  { %2293 = vpow2.f32 %v1866_v24 }
0x111e   :  { %v2290_v39 = vpop.eup %2289 }
0x111f   :  { %1353 = vrot.lane.b32.xlu1 %v2290_v39, %s2334_s27  ;;  %v2292_v23 = vpop.eup %2291 }
0x1120   :  { %v1339_v25 = vadd.f32 1.0, %v2292_v23  ;;  %v2294_v20 = vpop.eup %2293 }
0x1121   :  { %v1340_v31 = vadd.f32 1.0, %v2294_v20 }
0x1122   :  { %2295 = vrcp.f32 %v1339_v25 }
0x1123   :  { %2297 = vrcp.f32 %v1340_v31 }
0x112f   :  { %v2296_v26 = vpop.eup %2295 }
0x1130   :  { %v2298_v32 = vpop.eup %2297  ;;  %v1347_v35 = vmul.f32 %v2296_v26, %v2681_v55 }
0x1131   :  { %v1348_v45 = vmul.f32 %v2298_v32, %v2685_v58 }
0x117f   :  { %v1352_v27 = vpop.permute.xlu0 %1351 }
0x1180   :  { %v1357_v30 = vmul.f32 %v2296_v26, %v1352_v27 }
0x1182   :  { %1361 = vrot.lane.b32.xlu0 %v1357_v30, %s2335_s28 }
0x1191   :  { %v1354_v33 = vpop.permute.xlu1 %1353 }
0x1192   :  { %v1358_v42 = vmul.f32 %v2298_v32, %v1354_v33 }
0x1194   :  { %1363 = vrot.lane.b32.xlu1 %v1358_v42, %s2335_s28 }
0x11f4   :  { %v1362_v38 = vpop.permute.xlu0 %1361 }
0x11f5   :  { %v2721_v43 = vadd.f32 %v1362_v38, %v1347_v35 }
0x11f7   :  { %2299 = vtanh.f32 %v2721_v43 }
0x1204   :  { %v2300_v44 = vpop.eup %2299 }
0x1205   :  { %1373 = vrot.lane.b32.xlu0 %v2300_v44, %s2334_s27 }
0x1206   :  { %v1364_v46 = vpop.permute.xlu1 %1363 }
0x1207   :  { %v2726_v40 = vadd.f32 %v1364_v46, %v1348_v45 }
0x1209   :  { %2301 = vtanh.f32 %v2726_v40 }
0x1216   :  { %v2302_v47 = vpop.eup %2301 }
0x1217   :  { %1375 = vrot.lane.b32.xlu1 %v2302_v47, %s2334_s27  ;;  %v2330_v47 = vld [vmem:[%s2812_s6] ss:$0 sm:$0xff] }
0x1277   :  { %v1374_v48 = vpop.permute.xlu0 %1373 }
0x1278   :  { %v1379_v49 = vmul.f32 %v2296_v26, %v1374_v48 }
0x127a   :  { %v1381_v51 = vpack.c.bf16 %v1379_v49, %v1379_v49 }
0x127c   :  { %1383 = vrot.lane.b32.xlu0 %v1381_v51, %s2335_s28 }
0x1289   :  { %v1376_v52 = vpop.permute.xlu1 %1375 }
0x128a   :  { %v1380_v53 = vmul.f32 %v2298_v32, %v1376_v52 }
0x128c   :  { %v1429_v37 = vpack.c.bf16 %v1380_v53, %v1380_v53 }
0x128e   :  { %1431 = vrot.lane.b32.xlu1 %v1429_v37, %s2335_s28 }
0x12ee   :  { %v1384_v54 = vpop.permute.xlu0 %1383 }
0x12ef   :  { %2131 = vmatmul.mubr.msk.bf16.vlgmr.msra.gmra.mxu1 %vm191_vm2, %v1384_v54 }
0x12f0   :  { %2143 = vmatpush3.bf16.msra.mxu1 %v2479_v34  ;;  %2146 = vmatprep.mubr.msk.bf16.mxu1 %vm2332_vm0, %v2331_v0 }
0x12f1   :  { %2144 = vmatprep.subr.bf16.mxu1 %v2331_v0 }
0x12f4   :  { %2145 = vmatpush3.bf16.msra.mxu1 %v2486_v36 }
0x12f5   :  { %2158 = vmatprep.subr.bf16.mxu1 %v2331_v0 }
0x12f7   :  { %2147 = vmatmul.mubr.msk.bf16.vlgmr.msra.gmra.mxu1 %vm191_vm2, %v1384_v54 }
0x12f8   :  { %2159 = vmatpush3.bf16.msra.mxu1 %v2479_v34  ;;  %2162 = vmatprep.mubr.msk.bf16.mxu1 %vm2332_vm0, %v2331_v0  ;;  %v2328_v34 = vld [vmem:[%s2810_s5] sm:$0xff]  }
0x12f9   :  { %2160 = vmatprep.subr.bf16.mxu1 %v2331_v0 }
0x12fc   :  { %2161 = vmatpush3.bf16.msra.mxu1 %v2486_v36  ;;  %v2329_v36 = vld [vmem:[%s2809_s3] ss:$0 sm:$0xff] }
0x12fd   :  { %2174 = vmatprep.subr.bf16.mxu1 %v2331_v0  ;;  %v157_v57 = vadd.f32 %v2329_v36, %v2506_v41 }
0x1300   :  { %v1432_v55 = vpop.permute.xlu1 %1431 }
0x1301   :  { %2139 = vmatmul.mubr.msk.bf16.vlgmr.msra.gmra.mxu0 %vm191_vm2, %v1432_v55 }
0x1302   :  { %2151 = vmatpush3.bf16.msra.mxu0 %v2327_v56  ;;  %2154 = vmatprep.mubr.msk.bf16.mxu0 %vm2332_vm0, %v2331_v0 }
0x1303   :  { %2152 = vmatprep.subr.bf16.mxu0 %v2331_v0 }
0x1306   :  { %2153 = vmatpush3.bf16.msra.mxu0 %v2328_v34 }
0x1307   :  { %2166 = vmatprep.subr.bf16.mxu0 %v2331_v0 }
0x13af   :  { %v1422_v7 = vpop.f32.mrf.mxu1 }
0x13b0   :  { %v1428_v58 = vadd.f32 %v1422_v7, %v157_v57 }
0x13b1   :  { %v2132_v59 = vpop.f32.mrf.mxu1 }
0x13b2   :  { %2303 = vtanh.f32 %v1428_v58  ;;  %v1870_v14 = vmul.f32 -1.442695, %v1428_v58 }
0x13b3   :  { %v1425_v60 = vpop.f32.mrf.mxu1 }
0x13b4   :  { %v2196_v60 = vld [vmem:[%s2813_s7 + $0x8] sm:$0xff]  }
0x13b5   :  { %v2133_v61 = vpop.f32.mrf.mxu1 }
0x13b6   :  { %v2197_v61 = vld [vmem:[%s2813_s7] sm:$0xff]  }
0x13b7   :  { %v1510_v62 = vpop.f32.mrf.mxu1 }
0x13b9   :  { %v2148_v63 = vpop.f32.mrf.mxu1 }
0x13ba   :  { %v2198_v63 = vld [vmem:[%s2814_s9] sm:$0xff]  }
0x13bb   :  { %v1513_v3 = vpop.f32.mrf.mxu1 }
0x13bd   :  { %v2149_v4 = vpop.f32.mrf.mxu1 }
0x13bf   :  { %v2304_v1 = vpop.eup %2303 }
0x13c0   :  { %1535 = vrot.lane.b32.xlu1 %v2304_v1, %s2334_s27 }
0x13c1   :  { %v1470_v9 = vpop.f32.mrf.mxu0 }
0x13c2   :  { %v1471_v28 = vadd.f32 %v2514_v50, %v1470_v9 }
0x13c3   :  { %v2140_v29 = vpop.f32.mrf.mxu0 }
0x13c4   :  { %v1516_v6 = vadd.f32 %v1510_v62, %v1471_v28 }
0x13c5   :  { %v1473_v10 = vpop.f32.mrf.mxu0 }
0x13c6   :  { %2305 = vtanh.f32 %v1516_v6  ;;  %v1871_v11 = vmul.f32 -1.442695, %v1516_v6 }
0x13c7   :  { %v2141_v41 = vpop.f32.mrf.mxu0  ;;  %2307 = vpow2.f32 %v1870_v14 }
0x13d3   :  { %v2306_v12 = vpop.eup %2305 }
0x13d4   :  { %1537 = vrot.lane.b32.xlu0 %v2306_v12, %s2334_s27  ;;  %v2308_v15 = vpop.eup %2307 }
0x13d5   :  { %v1523_v2 = vadd.f32 1.0, %v2308_v15  ;;  %v1879_v15 = vld [vmem:[%s2816_s10] ss:$0 sm:$0xff] }
0x13d7   :  { %2309 = vrcp.f32 %v1523_v2 }
0x13d8   :  { %2311 = vpow2.f32 %v1871_v11 }
0x13e4   :  { %v2310_v13 = vpop.eup %2309 }
0x13e5   :  { %v2312_v19 = vpop.eup %2311  ;;  %v1531_v8 = vmul.f32 %v2310_v13, %v2721_v43 }
0x13e6   :  { %v1524_v50 = vadd.f32 1.0, %v2312_v19 }
0x13e8   :  { %2313 = vrcp.f32 %v1524_v50 }
0x13f5   :  { %v2314_v5 = vpop.eup %2313 }
0x13f6   :  { %v1532_v24 = vmul.f32 %v2314_v5, %v2726_v40 }
0x1432   :  { %v1536_v18 = vpop.permute.xlu1 %1535 }
0x1433   :  { %v1541_v21 = vmul.f32 %v2310_v13, %v1536_v18 }
0x1435   :  { %1545 = vrot.lane.b32.xlu1 %v1541_v21, %s2335_s28 }
0x1446   :  { %v1538_v17 = vpop.permute.xlu0 %1537 }
0x1447   :  { %v1542_v16 = vmul.f32 %v2314_v5, %v1538_v17 }
0x1449   :  { %1547 = vrot.lane.b32.xlu0 %v1542_v16, %s2335_s28 }
0x14a7   :  { %v1546_v39 = vpop.permute.xlu1 %1545 }
0x14a8   :  { %v1551_v22 = vadd.f32 %v1546_v39, %v1531_v8 }
0x14aa   :  { %2315 = vtanh.f32 %v1551_v22 }
0x14b7   :  { %v2316_v23 = vpop.eup %2315 }
0x14b8   :  { %1557 = vrot.lane.b32.xlu1 %v2316_v23, %s2334_s27 }
0x14bb   :  { %v1548_v25 = vpop.permute.xlu0 %1547 }
0x14bc   :  { %v1552_v20 = vadd.f32 %v1548_v25, %v1532_v24 }
0x14be   :  { %2317 = vtanh.f32 %v1552_v20 }
0x14cb   :  { %v2318_v26 = vpop.eup %2317 }
0x14cc   :  { %1559 = vrot.lane.b32.xlu0 %v2318_v26, %s2334_s27 }
0x152a   :  { %v1558_v27 = vpop.permute.xlu1 %1557 }
0x152b   :  { %v1563_v30 = vmul.f32 %v2310_v13, %v1558_v27 }
0x152d   :  { %v1612_v31 = vpack.c.bf16 %v1563_v30, %v1563_v30 }
0x152f   :  { %1614 = vrot.lane.b32.xlu1 %v1612_v31, %s2335_s28 }
0x153e   :  { %v1560_v32 = vpop.permute.xlu0 %1559 }
0x153f   :  { %v1564_v33 = vmul.f32 %v2314_v5, %v1560_v32 }
0x1541   :  { %v1565_v42 = vpack.c.bf16 %v1564_v33, %v1564_v33 }
0x1543   :  { %1567 = vrot.lane.b32.xlu0 %v1565_v42, %s2335_s28 }
0x15a1   :  { %v1615_v35 = vpop.permute.xlu1 %1614 }
0x15a2   :  { %2163 = vmatmul.mubr.msk.bf16.vlgmr.msra.gmra.mxu1 %vm191_vm2, %v1615_v35 }
0x15a3   :  { %2176 = vmatprep.mubr.msk.bf16.mxu1 %vm2332_vm0, %v2331_v0  ;;  %2175 = vmatpush3.bf16.msra.mxu1 %v2198_v63 }
0x15b5   :  { %v1568_v38 = vpop.permute.xlu0 %1567 }
0x15b6   :  { %2155 = vmatmul.mubr.msk.bf16.vlgmr.msra.gmra.mxu0 %vm191_vm2, %v1568_v38 }
0x15b7   :  { %2170 = vmatprep.mubr.msk.bf16.mxu0 %vm2332_vm0, %v2331_v0  ;;  %2167 = vmatpush3.bf16.msra.mxu0 %v2196_v60 }
0x15b8   :  { %2168 = vmatprep.subr.bf16.mxu0 %v2331_v0  ;;  %v1875_v0 = vld [vmem:[%s2815_s8] ss:$0 sm:$0xff] }
0x15bb   :  { %2169 = vmatpush3.bf16.msra.mxu0 %v2197_v61 }
0x1662   :  { %v1653_v43 = vpop.f32.mrf.mxu1 }
0x1664   :  { %v2164_v44 = vpop.f32.mrf.mxu1 }
0x1666   :  { %v1656_v45 = vpop.f32.mrf.mxu1 }
0x1668   :  { %v2165_v46 = vpop.f32.mrf.mxu1 }
0x1676   :  { %v1606_v40 = vpop.f32.mrf.mxu0 }
0x1677   :  { %v1607_v48 = vadd.f32 %v2330_v47, %v1606_v40 }
0x1678   :  { %v2156_v49 = vpop.f32.mrf.mxu0 }
0x1679   :  { %v1659_v51 = vadd.f32 %v1653_v43, %v1607_v48 }
0x167a   :  { %v1609_v52 = vpop.f32.mrf.mxu0 }
0x167b   :  { %2319 = vtanh.f32 %v1659_v51  ;;  %v1874_v54 = vmul.f32 -1.442695, %v1659_v51 }
0x167c   :  { %v2157_v53 = vpop.f32.mrf.mxu0 }
0x167d   :  { %2321 = vpow2.f32 %v1874_v54 }
0x1688   :  { %v2320_v37 = vpop.eup %2319 }
0x1689   :  { %1669 = vrot.lane.b32.xlu0 %v2320_v37, %s2334_s27 }
0x168a   :  { %v2322_v55 = vpop.eup %2321 }
0x168b   :  { %v1663_v56 = vadd.f32 1.0, %v2322_v55 }
0x168d   :  { %2323 = vrcp.f32 %v1663_v56 }
0x169a   :  { %v2324_v34 = vpop.eup %2323 }
0x169b   :  { %v1667_v7 = vmul.f32 %v2324_v34, %v1552_v20 }
0x16fb   :  { %v1670_v36 = vpop.permute.xlu0 %1669 }
0x16fc   :  { %v1672_v57 = vmul.f32 %v2324_v34, %v1670_v36 }
0x16fe   :  { %1674 = vrot.lane.b32.xlu1 %v1672_v57, %s2335_s28 }
0x1770   :  { %v1675_v58 = vpop.permute.xlu1 %1674 }
0x1771   :  { %v1677_v59 = vadd.f32 %v1675_v58, %v1667_v7 }
0x1773   :  { %2325 = vtanh.f32 %v1677_v59 }
0x1780   :  { %v2326_v62 = vpop.eup %2325 }
0x1781   :  { %1680 = vrot.lane.b32.xlu0 %v2326_v62, %s2334_s27 }
0x17f3   :  { %v1681_v3 = vpop.permute.xlu0 %1680 }
0x17f4   :  { %v1683_v4 = vmul.f32 %v2324_v34, %v1681_v3 }
0x17f6   :  { %v1684_v1 = vpack.c.bf16 %v1683_v4, %v1683_v4 }
0x17f8   :  { %1697 = vrot.lane.b32.xlu1 %v1684_v1, %s2335_s28 }
0x186a   :  { %v1698_v9 = vpop.permute.xlu1 %1697 }
0x186b   :  { %2171 = vmatmul.mubr.msk.bf16.vlgmr.msra.gmra.mxu0 %vm191_vm2, %v1698_v9 }
0x192b   :  { %v1748_v28 = vpop.f32.mrf.mxu0 }
0x192c   :  { %v1749_v29 = vadd.f32 %v1875_v0, %v1748_v28 }
0x192d   :  { %v2172_v6 = vpop.f32.mrf.mxu0 }
0x192e   :  { %v1754_v10 = vmax.f32 %v1749_v29, 0.0 }
0x192f   :  { %v1751_v41 = vpop.f32.mrf.mxu0 }
0x1930   :  { %v1755_v12 = vpack.c.bf16 %v1754_v10, %v1754_v10 }
0x1931   :  { %v2173_v14 = vpop.f32.mrf.mxu0 }
0x1932   :  { %2177 = vmatmul.mubr.msk.bf16.vlgmr.msra.gmra.mxu1 %vm82_vm1, %v1755_v12 }
0x19f2   :  { %v1808_v2 = vpop.f32.mrf.mxu1 }
0x19f3   :  { %v1809_v11 = vadd.f32 %v1879_v15, %v1808_v2 }
0x19f4   :  { %v2178_v13 = vpop.f32.mrf.mxu1 }
0x19f5   :  { %1815 = vst.msk [vmem:[%s2817_s11] sm:$0xff] %vm1814_vm3, %v1809_v11 }
0x19f6   :  { %v1811_v18 = vpop.f32.mrf.mxu1 }
0x19f8   :  { %v2179_v19 = vpop.f32.mrf.mxu1 }

</bundles_post_ra>
